<compile_context>
chip_gen: v7x
topology: tpu7x:2x2x1
jax: 0.10.0
libtpu: 0.0.40
codegen_flags: <defaults>
</compile_context>

<pallas_src>
import functools

import jax
import jax.numpy as jnp
from jax.experimental import pallas as pl
from jax.experimental.pallas import tpu as pltpu


# ----------------------------------------------------------------------------
# Fused kernel
# ----------------------------------------------------------------------------
def _apply_act(y, act):
    if act == "RE":
        return jnp.maximum(y, 0.0)
    # h_swish: x * relu6(x + 3) / 6
    return y * (jnp.clip(y + 3.0, 0.0, 6.0) * (1.0 / 6.0))


def _fused_mobile_block_kernel(*refs, k, pad, W, bt, se, act, use_connect,
                               mm_dtype):
    it = iter(refs)
    x_ref = next(it)          # (cin, N) f32, N = bt*H*W lanes ([img0|img1|...])
    w1_ref = next(it)         # (exp, cin)  mm_dtype, BN1 scale folded
    b1_ref = next(it)         # (exp, 1)    f32
    dw_ref = next(it)         # (exp, k*k)  f32, BN2 scale folded
    rm_ref = next(it)         # (k, N)      row-validity mask per kh offset
    cm_ref = next(it)         # (k, N)      col-validity mask per kw offset
    b2_ref = next(it)         # (exp, 1)    f32
    if se:
        pool_ref = next(it)   # (N, bt)     per-image (strided) avg-pool weights
        sw1_ref = next(it)    # (exp//4, exp)
        sb1_ref = next(it)    # (exp//4, 1)
        sw2_ref = next(it)    # (exp, exp//4)
        sb2_ref = next(it)    # (exp, 1)
        seg_ref = next(it) if bt > 1 else None   # (bt, N) image indicator
    w3_ref = next(it)         # (cout, exp) mm_dtype, BN3 scale folded
    b3_ref = next(it)         # (cout, 1)   f32
    o_ref = next(it)          # (cout, N)

    f32 = jnp.float32
    N = x_ref.shape[1]

    # ---- stage 1: 1x1 expand conv (+folded BN) + act --- lane-dense MXU -----
    x = x_ref[...]                                                  # (cin, N)
    y1 = jnp.dot(w1_ref[...], x.astype(mm_dtype), preferred_element_type=f32)
    y1 = _apply_act(y1 + b1_ref[...], act)                          # (exp, N)

    # ---- stage 2: depthwise KxK conv (+folded BN) via XLU rolls -------------
    # Each tap is an in-register lane rotation of y1; row masks (per kh) and
    # column masks (per kw) zero the positions whose source pixel falls outside
    # the image (this also prevents leakage across the images folded into the
    # lane axis).  Masks are hoisted out of the inner loop.
    rowshift = []
    for kh in range(k):
        dr = (kh - pad) * W
        t = y1 if dr == 0 else pltpu.roll(y1, (-dr) % N, 1)
        if kh != pad:                      # kh == pad row mask is all-ones
            t = t * rm_ref[kh:kh + 1, :]
        rowshift.append(t)

    acc = None
    for kw in range(k):
        dc = kw - pad
        part = None
        for kh in range(k):
            tap = (rowshift[kh] if dc == 0
                   else pltpu.roll(rowshift[kh], (-dc) % N, 1))
            term = tap * dw_ref[:, kh * k + kw:kh * k + kw + 1]     # (exp, N)
            part = term if part is None else part + term
        if kw != pad:                      # kw == pad column mask is all-ones
            part = part * cm_ref[kw:kw + 1, :]
        acc = part if acc is None else acc + part
    y2 = acc + b2_ref[...]                                          # (exp, N)

    # ---- stage 3: squeeze-and-excite, fully fused ---------------------------
    if se:
        # Per-image global average pool (decimation mask + 1/(Ho*Wo) folded
        # into pool_ref), then two tiny dense layers, batched over images.
        pooled = jnp.dot(y2, pool_ref[...], preferred_element_type=f32)  # (exp, bt)
        hid = jnp.dot(sw1_ref[...], pooled, preferred_element_type=f32) + sb1_ref[...]
        hid = jnp.maximum(hid, 0.0)
        gate = jnp.dot(sw2_ref[...], hid, preferred_element_type=f32) + sb2_ref[...]
        gate = jnp.clip(gate + 3.0, 0.0, 6.0) * (1.0 / 6.0)              # (exp, bt)
        if bt > 1:
            # Broadcast each image's gate over its lane segment (tiny MXU op).
            gate = jnp.dot(gate, seg_ref[...], preferred_element_type=f32)
        # TODO(synk): when bt == 1 the per-channel gate could be folded into
        # w3's columns to skip this full-width VPU multiply.
        y2 = y2 * gate

    # ---- stage 4: 1x1 project conv (+folded BN) + act (+ residual) ----------
    z = jnp.dot(w3_ref[...], y2.astype(mm_dtype), preferred_element_type=f32)
    z = _apply_act(z + b3_ref[...], act)
    if use_connect:
        z = z + x                      # cin == cout and stride == 1 here
    o_ref[...] = z.astype(o_ref.dtype)


# ----------------------------------------------------------------------------
# Wrapper: host-side constant folding + pallas_call setup
# ----------------------------------------------------------------------------
def mobile_block_forward(x_nchw, p, cfg, *, matmul_dtype=jnp.bfloat16,
                         batch_tile=None):
    n, cin, h, w = x_nchw.shape
    k = cfg["kernel_size"]
    stride = cfg["stride"]
    pad = cfg["padding"]
    exp = cfg["exp_size"]
    cout = cfg["out_channels"]
    se = cfg["SE"]
    use_connect = cfg["use_connect"]
    f32 = jnp.float32

    hw = h * w
    ho = (h + 2 * pad - k) // stride + 1
    wo = (w + 2 * pad - k) // stride + 1

    # Fold several images onto the lane axis per grid step (bigger lane-dense
    # tiles -> better HBM roofline fraction, amortized per-step overhead).
    if batch_tile is None:
        bt = 1
        for cand in range(n, 0, -1):
            if n % cand == 0 and (cand * hw <= 4096 or cand == 1):
                bt = cand
                break
    else:
        bt = int(batch_tile)
    assert n % bt == 0
    if bt < n and (bt * hw) % 128 != 0:
        bt = n                     # lane block must be 128-aligned or full-axis
    N = bt * hw

    # (C, lanes) layout: lanes = [image0 pixels | image1 pixels | ...].
    xt = jnp.transpose(x_nchw.reshape(n, cin, hw), (1, 0, 2)).reshape(cin, n * hw)
    xt = xt.astype(f32)

    # Fold BN scales (+ conv biases) into weights / per-channel biases.
    w1s = (p["w1"].astype(f32).T * p["scale1"][:, None]).astype(matmul_dtype)       # (exp, cin)
    dws = (p["dw_w"].astype(f32) * p["scale2"][None, None, :]).reshape(k * k, exp).T  # (exp, k*k)
    w3s = (p["w3"].astype(f32).T * p["scale3"][:, None]).astype(matmul_dtype)       # (cout, exp)

    # Depthwise validity masks (row offsets kh, column offsets kw), tiled over
    # the images folded into the lane axis.
    pos = jnp.arange(hw, dtype=jnp.int32)
    row, col = pos // w, pos % w
    rmask = jnp.stack([((row + (kh - pad) >= 0) & (row + (kh - pad) < h)).astype(f32)
                       for kh in range(k)], axis=0)                  # (k, hw)
    cmask = jnp.stack([((col + (kw - pad) >= 0) & (col + (kw - pad) < w)).astype(f32)
                       for kw in range(k)], axis=0)                  # (k, hw)
    rmask = jnp.tile(rmask, (1, bt))                                 # (k, N)
    cmask = jnp.tile(cmask, (1, bt))

    const = lambda i: (0, 0)
    args = [xt,
            w1s, p["bias1"].reshape(exp, 1).astype(f32),
            dws, rmask, cmask, p["bias2"].reshape(exp, 1).astype(f32)]
    in_specs = [pl.BlockSpec((cin, N), lambda i: (0, i)),
                pl.BlockSpec((exp, cin), const),
                pl.BlockSpec((exp, 1), const),
                pl.BlockSpec((exp, k * k), const),
                pl.BlockSpec((k, N), const),
                pl.BlockSpec((k, N), const),
                pl.BlockSpec((exp, 1), const)]
    if se:
        cr = p["se_w1"].shape[1]
        img = jnp.arange(N, dtype=jnp.int32) // hw                   # image id per lane
        # Positions surviving the stride decimation (the SE pool in the
        # reference is taken over the strided map).
        dec = ((row % stride == 0) & (row // stride < ho) &
               (col % stride == 0) & (col // stride < wo)).astype(f32)
        dec = jnp.tile(dec, (bt,))                                   # (N,)
        pool = ((img[:, None] == jnp.arange(bt)[None, :]).astype(f32)
                * dec[:, None]) * (1.0 / (ho * wo))                  # (N, bt)
        args += [pool,
                 p["se_w1"].astype(f32).T, p["se_b1"].reshape(cr, 1).astype(f32),
                 p["se_w2"].astype(f32).T, p["se_b2"].reshape(exp, 1).astype(f32)]
        in_specs += [pl.BlockSpec((N, bt), const),
                     pl.BlockSpec((cr, exp), const),
                     pl.BlockSpec((cr, 1), const),
                     pl.BlockSpec((exp, cr), const),
                     pl.BlockSpec((exp, 1), const)]
        if bt > 1:
            seg = (jnp.arange(bt)[:, None] == img[None, :]).astype(f32)   # (bt, N)
            args.append(seg)
            in_specs.append(pl.BlockSpec((bt, N), const))
    args += [w3s, p["bias3"].reshape(cout, 1).astype(f32)]
    in_specs += [pl.BlockSpec((cout, exp), const),
                 pl.BlockSpec((cout, 1), const)]

    kernel = functools.partial(
        _fused_mobile_block_kernel, k=k, pad=pad, W=w, bt=bt, se=se,
        act=cfg["nonLinear"], use_connect=use_connect, mm_dtype=matmul_dtype)

    out = pl.pallas_call(
        kernel,
        out_shape=jax.ShapeDtypeStruct((cout, n * hw), jnp.float32),
        grid=(n // bt,),
        in_specs=in_specs,
        out_specs=pl.BlockSpec((cout, N), lambda i: (0, i)),
        compiler_params=pltpu.CompilerParams(
            dimension_semantics=("parallel",)),
    )(*args)

    # Back to NCHW; for stride>1 the exact strided column/row selection is done
    # here (1x1 convs, SE gate and activations commute with it), keeping every
    # in-kernel store lane-dense and avoiding any decimation matrix.
    full = out.reshape(cout, n, hw).transpose(1, 0, 2).reshape(n, cout, h, w)
    if stride > 1:
        full = full[:, :, :ho * stride:stride, :wo * stride:stride]
    return full


# ----------------------------------------------------------------------------
# Pure-JAX reference (for correctness check)
# ----------------------------------------------------------------------------
def mobile_block_reference(x_nchw, p, cfg):
    eps = 1e-5
    x = jnp.transpose(x_nchw, (0, 2, 3, 1)).astype(jnp.float32)

    def bn(y, g, b, m, v):
        return (y - m) * (g / jnp.sqrt(v + eps)) + b

    def act(y):
        if cfg["nonLinear"] == "RE":
            return jnp.maximum(y, 0.0)
        return y * (jnp.clip(y + 3.0, 0.0, 6.0) / 6.0)

    y = jnp.einsum("nhwc,cd->nhwd", x, p["w1"])
    y = act(bn(y, p["g1"], p["b1"], p["m1"], p["v1"]))

    dn = jax.lax.conv_dimension_numbers(y.shape, p["dw_hwio"].shape,
                                        ("NHWC", "HWIO", "NHWC"))
    y = jax.lax.conv_general_dilated(
        y, p["dw_hwio"], (cfg["stride"], cfg["stride"]),
        [(cfg["padding"], cfg["padding"])] * 2,
        dimension_numbers=dn, feature_group_count=cfg["exp_size"])
    y = bn(y + p["dw_b"], p["g2"], p["b2"], p["m2"], p["v2"])

    if cfg["SE"]:
        pooled = jnp.mean(y, axis=(1, 2))
        hid = jnp.maximum(pooled @ p["se_w1"] + p["se_b1"], 0.0)
        s = hid @ p["se_w2"] + p["se_b2"]
        s = jnp.clip(s + 3.0, 0.0, 6.0) / 6.0
        y = y * s[:, None, None, :]

    z = jnp.einsum("nhwc,cd->nhwd", y, p["w3"]) + p["pw_b"]
    z = act(bn(z, p["g3"], p["b3"], p["m3"], p["v3"]))
    if cfg["use_connect"]:
        z = x + z
    return jnp.transpose(z, (0, 3, 1, 2))


# ----------------------------------------------------------------------------
# Deterministic parameter init + driver
# ----------------------------------------------------------------------------
def make_params(key, cfg):
    cin, cout = cfg["in_channels"], cfg["out_channels"]
    exp, k = cfg["exp_size"], cfg["kernel_size"]
    eps = 1e-5
    ks = jax.random.split(key, 24)

    def rnd(kk, shape, s=0.1):
        return jax.random.normal(kk, shape, jnp.float32) * s

    p = {}
    # 1x1 expand conv (no bias) + BN1
    p["w1"] = rnd(ks[0], (cin, exp))
    p["g1"], p["b1"] = rnd(ks[1], (exp,)) + 1.0, rnd(ks[2], (exp,))
    p["m1"], p["v1"] = rnd(ks[3], (exp,)), jax.random.uniform(ks[4], (exp,), jnp.float32, 0.5, 1.5)
    # depthwise conv (bias) + BN2
    p["dw_w"] = rnd(ks[5], (k, k, exp))                     # (k, k, C)
    p["dw_hwio"] = p["dw_w"].reshape(k, k, 1, exp)          # HWIO for reference
    p["dw_b"] = rnd(ks[6], (exp,))
    p["g2"], p["b2"] = rnd(ks[7], (exp,)) + 1.0, rnd(ks[8], (exp,))
    p["m2"], p["v2"] = rnd(ks[9], (exp,)), jax.random.uniform(ks[10], (exp,), jnp.float32, 0.5, 1.5)
    # SE block (Linear weights stored already-transposed: x @ w + b)
    p["se_w1"], p["se_b1"] = rnd(ks[11], (exp, exp // 4)), rnd(ks[12], (exp // 4,))
    p["se_w2"], p["se_b2"] = rnd(ks[13], (exp // 4, exp)), rnd(ks[14], (exp,))
    # 1x1 project conv (bias) + BN3
    p["w3"] = rnd(ks[15], (exp, cout))
    p["pw_b"] = rnd(ks[16], (cout,))
    p["g3"], p["b3"] = rnd(ks[17], (cout,)) + 1.0, rnd(ks[18], (cout,))
    p["m3"], p["v3"] = rnd(ks[19], (cout,)), jax.random.uniform(ks[20], (cout,), jnp.float32, 0.5, 1.5)

    # Folded BN (+ conv bias) scale/bias used by the fused kernel.
    p["scale1"] = p["g1"] / jnp.sqrt(p["v1"] + eps)
    p["bias1"] = p["b1"] - p["m1"] * p["scale1"]
    p["scale2"] = p["g2"] / jnp.sqrt(p["v2"] + eps)
    p["bias2"] = p["b2"] + (p["dw_b"] - p["m2"]) * p["scale2"]
    p["scale3"] = p["g3"] / jnp.sqrt(p["v3"] + eps)
    p["bias3"] = p["b3"] + (p["pw_b"] - p["m3"]) * p["scale3"]
    return p


if __name__ == "__main__":
    base_key = jax.random.PRNGKey(0)

    # (config, matmul operand dtype, tolerance).  Case 0 runs the kernel with
    # f32 matmul operands for exact parity with the reference; the remaining
    # cases use the bf16 MXU fast path (f32 accumulation), hence looser tol.
    cases = [
        (dict(in_channels=8, out_channels=8, kernel_size=3, stride=1,
              nonLinear="HS", SE=True, exp_size=16), jnp.float32, 1e-4),
        (dict(in_channels=8, out_channels=8, kernel_size=3, stride=1,
              nonLinear="HS", SE=True, exp_size=16), jnp.bfloat16, 5e-2),
        (dict(in_channels=8, out_channels=12, kernel_size=5, stride=2,
              nonLinear="RE", SE=True, exp_size=16), jnp.bfloat16, 5e-2),
        (dict(in_channels=8, out_channels=8, kernel_size=3, stride=1,
              nonLinear="RE", SE=False, exp_size=16), jnp.bfloat16, 5e-2),
    ]

    for idx, (cfg, mm_dtype, tol) in enumerate(cases):
        cfg = dict(cfg)
        cfg["padding"] = (cfg["kernel_size"] - 1) // 2
        cfg["use_connect"] = (cfg["stride"] == 1 and
                              cfg["in_channels"] == cfg["out_channels"])

        kk = jax.random.fold_in(base_key, idx)
        k_x, k_p = jax.random.split(kk)
        x = jax.random.normal(k_x, (2, cfg["in_channels"], 16, 16), jnp.float32)
        params = make_params(k_p, cfg)

        out = jax.block_until_ready(
            mobile_block_forward(x, params, cfg, matmul_dtype=mm_dtype))
        ref = jax.block_until_ready(mobile_block_reference(x, params, cfg))

        ho = (16 + 2 * cfg["padding"] - cfg["kernel_size"]) // cfg["stride"] + 1
        assert out.shape == (2, cfg["out_channels"], ho, ho), (idx, out.shape)
        max_err = float(jnp.max(jnp.abs(out - ref)))
        assert jnp.allclose(out, ref, rtol=tol, atol=tol), (idx, max_err)

    print("KERNEL_OK")
</pallas_src>

<mosaic_0001>
module attributes {stable_mosaic.version = 11 : i64} {
  func.func @_fused_mobile_block_kernel(%arg0: i32, %arg1: memref<8x512xf32, #tpu.memory_space<vmem>>, %arg2: memref<16x8xf32, #tpu.memory_space<vmem>>, %arg3: memref<16x1xf32, #tpu.memory_space<vmem>>, %arg4: memref<16x9xf32, #tpu.memory_space<vmem>>, %arg5: memref<3x512xf32, #tpu.memory_space<vmem>>, %arg6: memref<3x512xf32, #tpu.memory_space<vmem>>, %arg7: memref<16x1xf32, #tpu.memory_space<vmem>>, %arg8: memref<512x2xf32, #tpu.memory_space<vmem>>, %arg9: memref<4x16xf32, #tpu.memory_space<vmem>>, %arg10: memref<4x1xf32, #tpu.memory_space<vmem>>, %arg11: memref<16x4xf32, #tpu.memory_space<vmem>>, %arg12: memref<16x1xf32, #tpu.memory_space<vmem>>, %arg13: memref<2x512xf32, #tpu.memory_space<vmem>>, %arg14: memref<8x16xf32, #tpu.memory_space<vmem>>, %arg15: memref<8x1xf32, #tpu.memory_space<vmem>>, %arg16: memref<8x512xf32, #tpu.memory_space<vmem>>) attributes {dimension_semantics = [#tpu.dimension_semantics<parallel>], iteration_bounds = array<i64: 1>, scalar_prefetch = 0 : i64, scratch_operands = 0 : i64, tpu.core_type = #tpu.core_type<tc>, window_params = [{transform_indices = @transform_0, window_bounds = array<i64: 8, 512>}, {pipeline_mode = #tpu.pipeline_mode<synchronous>, transform_indices = @transform_1, window_bounds = array<i64: 16, 8>}, {pipeline_mode = #tpu.pipeline_mode<synchronous>, transform_indices = @transform_2, window_bounds = array<i64: 16, 1>}, {pipeline_mode = #tpu.pipeline_mode<synchronous>, transform_indices = @transform_3, window_bounds = array<i64: 16, 9>}, {pipeline_mode = #tpu.pipeline_mode<synchronous>, transform_indices = @transform_4, window_bounds = array<i64: 3, 512>}, {pipeline_mode = #tpu.pipeline_mode<synchronous>, transform_indices = @transform_5, window_bounds = array<i64: 3, 512>}, {pipeline_mode = #tpu.pipeline_mode<synchronous>, transform_indices = @transform_6, window_bounds = array<i64: 16, 1>}, {pipeline_mode = #tpu.pipeline_mode<synchronous>, transform_indices = @transform_7, window_bounds = array<i64: 512, 2>}, {pipeline_mode = #tpu.pipeline_mode<synchronous>, transform_indices = @transform_8, window_bounds = array<i64: 4, 16>}, {pipeline_mode = #tpu.pipeline_mode<synchronous>, transform_indices = @transform_9, window_bounds = array<i64: 4, 1>}, {pipeline_mode = #tpu.pipeline_mode<synchronous>, transform_indices = @transform_10, window_bounds = array<i64: 16, 4>}, {pipeline_mode = #tpu.pipeline_mode<synchronous>, transform_indices = @transform_11, window_bounds = array<i64: 16, 1>}, {pipeline_mode = #tpu.pipeline_mode<synchronous>, transform_indices = @transform_12, window_bounds = array<i64: 2, 512>}, {pipeline_mode = #tpu.pipeline_mode<synchronous>, transform_indices = @transform_13, window_bounds = array<i64: 8, 16>}, {pipeline_mode = #tpu.pipeline_mode<synchronous>, transform_indices = @transform_14, window_bounds = array<i64: 8, 1>}, {transform_indices = @transform_15, window_bounds = array<i64: 8, 512>}]} {
    %c0 = arith.constant 0 : index
    %c0_0 = arith.constant 0 : index
    %0 = vector.load %arg1[%c0, %c0_0] : memref<8x512xf32, #tpu.memory_space<vmem>>, vector<8x512xf32>
    %c0_1 = arith.constant 0 : index
    %c0_2 = arith.constant 0 : index
    %1 = vector.load %arg2[%c0_1, %c0_2] : memref<16x8xf32, #tpu.memory_space<vmem>>, vector<16x8xf32>
    %cst = arith.constant dense<0.000000e+00> : vector<16x512xf32>
    %2 = tpu.matmul %1, %0, %cst {dimension_numbers = #tpu.dot_dimension_numbers<[1], [0], [0], [1], [0, 0, 1, 1], [], []>} : vector<16x8xf32>, vector<8x512xf32>, vector<16x512xf32> -> vector<16x512xf32>
    %c0_3 = arith.constant 0 : index
    %c0_4 = arith.constant 0 : index
    %3 = vector.load %arg3[%c0_3, %c0_4] : memref<16x1xf32, #tpu.memory_space<vmem>>, vector<16x1xf32>
    %4 = vector.broadcast %3 : vector<16x1xf32> to vector<16x512xf32>
    %5 = arith.addf %2, %4 : vector<16x512xf32>
    %cst_5 = arith.constant 3.000000e+00 : f32
    %6 = vector.broadcast %cst_5 : f32 to vector<16x512xf32>
    %7 = arith.addf %5, %6 : vector<16x512xf32>
    %cst_6 = arith.constant 0.000000e+00 : f32
    %cst_7 = arith.constant 6.000000e+00 : f32
    %8 = vector.broadcast %cst_6 : f32 to vector<16x512xf32>
    %9 = arith.maximumf %8, %7 : vector<16x512xf32>
    %10 = vector.broadcast %cst_7 : f32 to vector<16x512xf32>
    %11 = arith.minimumf %10, %9 : vector<16x512xf32>
    %cst_8 = arith.constant 0.166666672 : f32
    %12 = vector.broadcast %cst_8 : f32 to vector<16x512xf32>
    %13 = arith.mulf %11, %12 : vector<16x512xf32>
    %14 = arith.mulf %5, %13 : vector<16x512xf32>
    %c16_i32 = arith.constant 16 : i32
    %15 = tpu.dynamic_rotate %14 by %c16_i32 dim 1 : vector<16x512xf32>, i32 -> vector<16x512xf32>
    %c0_9 = arith.constant 0 : index
    %c0_10 = arith.constant 0 : index
    %16 = vector.load %arg5[%c0_9, %c0_10] : memref<3x512xf32, #tpu.memory_space<vmem>>, vector<1x512xf32>
    %17 = vector.broadcast %16 : vector<1x512xf32> to vector<16x512xf32>
    %18 = arith.mulf %15, %17 : vector<16x512xf32>
    %c496_i32 = arith.constant 496 : i32
    %19 = tpu.dynamic_rotate %14 by %c496_i32 dim 1 : vector<16x512xf32>, i32 -> vector<16x512xf32>
    %c2 = arith.constant 2 : index
    %c0_11 = arith.constant 0 : index
    %20 = vector.load %arg5[%c2, %c0_11] : memref<3x512xf32, #tpu.memory_space<vmem>>, vector<1x512xf32>
    %21 = vector.broadcast %20 : vector<1x512xf32> to vector<16x512xf32>
    %22 = arith.mulf %19, %21 : vector<16x512xf32>
    %c1_i32 = arith.constant 1 : i32
    %23 = tpu.dynamic_rotate %18 by %c1_i32 dim 1 : vector<16x512xf32>, i32 -> vector<16x512xf32>
    %c0_12 = arith.constant 0 : index
    %c0_13 = arith.constant 0 : index
    %24 = vector.load %arg4[%c0_12, %c0_13] : memref<16x9xf32, #tpu.memory_space<vmem>>, vector<16x1xf32>
    %25 = vector.broadcast %24 : vector<16x1xf32> to vector<16x512xf32>
    %26 = arith.mulf %23, %25 : vector<16x512xf32>
    %c1_i32_14 = arith.constant 1 : i32
    %27 = tpu.dynamic_rotate %14 by %c1_i32_14 dim 1 : vector<16x512xf32>, i32 -> vector<16x512xf32>
    %c0_15 = arith.constant 0 : index
    %c3 = arith.constant 3 : index
    %28 = vector.load %arg4[%c0_15, %c3] : memref<16x9xf32, #tpu.memory_space<vmem>>, vector<16x1xf32>
    %29 = vector.broadcast %28 : vector<16x1xf32> to vector<16x512xf32>
    %30 = arith.mulf %27, %29 : vector<16x512xf32>
    %31 = arith.addf %26, %30 : vector<16x512xf32>
    %c1_i32_16 = arith.constant 1 : i32
    %32 = tpu.dynamic_rotate %22 by %c1_i32_16 dim 1 : vector<16x512xf32>, i32 -> vector<16x512xf32>
    %c0_17 = arith.constant 0 : index
    %c6 = arith.constant 6 : index
    %33 = vector.load %arg4[%c0_17, %c6] : memref<16x9xf32, #tpu.memory_space<vmem>>, vector<16x1xf32>
    %34 = vector.broadcast %33 : vector<16x1xf32> to vector<16x512xf32>
    %35 = arith.mulf %32, %34 : vector<16x512xf32>
    %36 = arith.addf %31, %35 : vector<16x512xf32>
    %c0_18 = arith.constant 0 : index
    %c0_19 = arith.constant 0 : index
    %37 = vector.load %arg6[%c0_18, %c0_19] : memref<3x512xf32, #tpu.memory_space<vmem>>, vector<1x512xf32>
    %38 = vector.broadcast %37 : vector<1x512xf32> to vector<16x512xf32>
    %39 = arith.mulf %36, %38 : vector<16x512xf32>
    %c0_20 = arith.constant 0 : index
    %c1 = arith.constant 1 : index
    %40 = vector.load %arg4[%c0_20, %c1] : memref<16x9xf32, #tpu.memory_space<vmem>>, vector<16x1xf32>
    %41 = vector.broadcast %40 : vector<16x1xf32> to vector<16x512xf32>
    %42 = arith.mulf %18, %41 : vector<16x512xf32>
    %c0_21 = arith.constant 0 : index
    %c4 = arith.constant 4 : index
    %43 = vector.load %arg4[%c0_21, %c4] : memref<16x9xf32, #tpu.memory_space<vmem>>, vector<16x1xf32>
    %44 = vector.broadcast %43 : vector<16x1xf32> to vector<16x512xf32>
    %45 = arith.mulf %14, %44 : vector<16x512xf32>
    %46 = arith.addf %42, %45 : vector<16x512xf32>
    %c0_22 = arith.constant 0 : index
    %c7 = arith.constant 7 : index
    %47 = vector.load %arg4[%c0_22, %c7] : memref<16x9xf32, #tpu.memory_space<vmem>>, vector<16x1xf32>
    %48 = vector.broadcast %47 : vector<16x1xf32> to vector<16x512xf32>
    %49 = arith.mulf %22, %48 : vector<16x512xf32>
    %50 = arith.addf %46, %49 : vector<16x512xf32>
    %51 = arith.addf %39, %50 : vector<16x512xf32>
    %c511_i32 = arith.constant 511 : i32
    %52 = tpu.dynamic_rotate %18 by %c511_i32 dim 1 : vector<16x512xf32>, i32 -> vector<16x512xf32>
    %c0_23 = arith.constant 0 : index
    %c2_24 = arith.constant 2 : index
    %53 = vector.load %arg4[%c0_23, %c2_24] : memref<16x9xf32, #tpu.memory_space<vmem>>, vector<16x1xf32>
    %54 = vector.broadcast %53 : vector<16x1xf32> to vector<16x512xf32>
    %55 = arith.mulf %52, %54 : vector<16x512xf32>
    %c511_i32_25 = arith.constant 511 : i32
    %56 = tpu.dynamic_rotate %14 by %c511_i32_25 dim 1 : vector<16x512xf32>, i32 -> vector<16x512xf32>
    %c0_26 = arith.constant 0 : index
    %c5 = arith.constant 5 : index
    %57 = vector.load %arg4[%c0_26, %c5] : memref<16x9xf32, #tpu.memory_space<vmem>>, vector<16x1xf32>
    %58 = vector.broadcast %57 : vector<16x1xf32> to vector<16x512xf32>
    %59 = arith.mulf %56, %58 : vector<16x512xf32>
    %60 = arith.addf %55, %59 : vector<16x512xf32>
    %c511_i32_27 = arith.constant 511 : i32
    %61 = tpu.dynamic_rotate %22 by %c511_i32_27 dim 1 : vector<16x512xf32>, i32 -> vector<16x512xf32>
    %c0_28 = arith.constant 0 : index
    %c8 = arith.constant 8 : index
    %62 = vector.load %arg4[%c0_28, %c8] : memref<16x9xf32, #tpu.memory_space<vmem>>, vector<16x1xf32>
    %63 = vector.broadcast %62 : vector<16x1xf32> to vector<16x512xf32>
    %64 = arith.mulf %61, %63 : vector<16x512xf32>
    %65 = arith.addf %60, %64 : vector<16x512xf32>
    %c2_29 = arith.constant 2 : index
    %c0_30 = arith.constant 0 : index
    %66 = vector.load %arg6[%c2_29, %c0_30] : memref<3x512xf32, #tpu.memory_space<vmem>>, vector<1x512xf32>
    %67 = vector.broadcast %66 : vector<1x512xf32> to vector<16x512xf32>
    %68 = arith.mulf %65, %67 : vector<16x512xf32>
    %69 = arith.addf %51, %68 : vector<16x512xf32>
    %c0_31 = arith.constant 0 : index
    %c0_32 = arith.constant 0 : index
    %70 = vector.load %arg7[%c0_31, %c0_32] : memref<16x1xf32, #tpu.memory_space<vmem>>, vector<16x1xf32>
    %71 = vector.broadcast %70 : vector<16x1xf32> to vector<16x512xf32>
    %72 = arith.addf %69, %71 : vector<16x512xf32>
    %c0_33 = arith.constant 0 : index
    %c0_34 = arith.constant 0 : index
    %73 = vector.load %arg8[%c0_33, %c0_34] : memref<512x2xf32, #tpu.memory_space<vmem>>, vector<512x2xf32>
    %cst_35 = arith.constant dense<0.000000e+00> : vector<16x2xf32>
    %74 = tpu.matmul %72, %73, %cst_35 {dimension_numbers = #tpu.dot_dimension_numbers<[1], [0], [0], [1], [0, 0, 1, 1], [], []>} : vector<16x512xf32>, vector<512x2xf32>, vector<16x2xf32> -> vector<16x2xf32>
    %c0_36 = arith.constant 0 : index
    %c0_37 = arith.constant 0 : index
    %75 = vector.load %arg9[%c0_36, %c0_37] : memref<4x16xf32, #tpu.memory_space<vmem>>, vector<4x16xf32>
    %cst_38 = arith.constant dense<0.000000e+00> : vector<4x2xf32>
    %76 = tpu.matmul %75, %74, %cst_38 {dimension_numbers = #tpu.dot_dimension_numbers<[1], [0], [0], [1], [0, 0, 1, 1], [], []>} : vector<4x16xf32>, vector<16x2xf32>, vector<4x2xf32> -> vector<4x2xf32>
    %c0_39 = arith.constant 0 : index
    %c0_40 = arith.constant 0 : index
    %77 = vector.load %arg10[%c0_39, %c0_40] : memref<4x1xf32, #tpu.memory_space<vmem>>, vector<4x1xf32>
    %78 = vector.broadcast %77 : vector<4x1xf32> to vector<4x2xf32>
    %79 = arith.addf %76, %78 : vector<4x2xf32>
    %cst_41 = arith.constant 0.000000e+00 : f32
    %80 = vector.broadcast %cst_41 : f32 to vector<4x2xf32>
    %81 = arith.maximumf %79, %80 : vector<4x2xf32>
    %c0_42 = arith.constant 0 : index
    %c0_43 = arith.constant 0 : index
    %82 = vector.load %arg11[%c0_42, %c0_43] : memref<16x4xf32, #tpu.memory_space<vmem>>, vector<16x4xf32>
    %cst_44 = arith.constant dense<0.000000e+00> : vector<16x2xf32>
    %83 = tpu.matmul %82, %81, %cst_44 {dimension_numbers = #tpu.dot_dimension_numbers<[1], [0], [0], [1], [0, 0, 1, 1], [], []>} : vector<16x4xf32>, vector<4x2xf32>, vector<16x2xf32> -> vector<16x2xf32>
    %c0_45 = arith.constant 0 : index
    %c0_46 = arith.constant 0 : index
    %84 = vector.load %arg12[%c0_45, %c0_46] : memref<16x1xf32, #tpu.memory_space<vmem>>, vector<16x1xf32>
    %85 = vector.broadcast %84 : vector<16x1xf32> to vector<16x2xf32>
    %86 = arith.addf %83, %85 : vector<16x2xf32>
    %cst_47 = arith.constant 3.000000e+00 : f32
    %87 = vector.broadcast %cst_47 : f32 to vector<16x2xf32>
    %88 = arith.addf %86, %87 : vector<16x2xf32>
    %cst_48 = arith.constant 0.000000e+00 : f32
    %cst_49 = arith.constant 6.000000e+00 : f32
    %89 = vector.broadcast %cst_48 : f32 to vector<16x2xf32>
    %90 = arith.maximumf %89, %88 : vector<16x2xf32>
    %91 = vector.broadcast %cst_49 : f32 to vector<16x2xf32>
    %92 = arith.minimumf %91, %90 : vector<16x2xf32>
    %cst_50 = arith.constant 0.166666672 : f32
    %93 = vector.broadcast %cst_50 : f32 to vector<16x2xf32>
    %94 = arith.mulf %92, %93 : vector<16x2xf32>
    %c0_51 = arith.constant 0 : index
    %c0_52 = arith.constant 0 : index
    %95 = vector.load %arg13[%c0_51, %c0_52] : memref<2x512xf32, #tpu.memory_space<vmem>>, vector<2x512xf32>
    %cst_53 = arith.constant dense<0.000000e+00> : vector<16x512xf32>
    %96 = tpu.matmul %94, %95, %cst_53 {dimension_numbers = #tpu.dot_dimension_numbers<[1], [0], [0], [1], [0, 0, 1, 1], [], []>} : vector<16x2xf32>, vector<2x512xf32>, vector<16x512xf32> -> vector<16x512xf32>
    %97 = arith.mulf %72, %96 : vector<16x512xf32>
    %c0_54 = arith.constant 0 : index
    %c0_55 = arith.constant 0 : index
    %98 = vector.load %arg14[%c0_54, %c0_55] : memref<8x16xf32, #tpu.memory_space<vmem>>, vector<8x16xf32>
    %cst_56 = arith.constant dense<0.000000e+00> : vector<8x512xf32>
    %99 = tpu.matmul %98, %97, %cst_56 {dimension_numbers = #tpu.dot_dimension_numbers<[1], [0], [0], [1], [0, 0, 1, 1], [], []>} : vector<8x16xf32>, vector<16x512xf32>, vector<8x512xf32> -> vector<8x512xf32>
    %c0_57 = arith.constant 0 : index
    %c0_58 = arith.constant 0 : index
    %100 = vector.load %arg15[%c0_57, %c0_58] : memref<8x1xf32, #tpu.memory_space<vmem>>, vector<8x1xf32>
    %101 = vector.broadcast %100 : vector<8x1xf32> to vector<8x512xf32>
    %102 = arith.addf %99, %101 : vector<8x512xf32>
    %cst_59 = arith.constant 3.000000e+00 : f32
    %103 = vector.broadcast %cst_59 : f32 to vector<8x512xf32>
    %104 = arith.addf %102, %103 : vector<8x512xf32>
    %cst_60 = arith.constant 0.000000e+00 : f32
    %cst_61 = arith.constant 6.000000e+00 : f32
    %105 = vector.broadcast %cst_60 : f32 to vector<8x512xf32>
    %106 = arith.maximumf %105, %104 : vector<8x512xf32>
    %107 = vector.broadcast %cst_61 : f32 to vector<8x512xf32>
    %108 = arith.minimumf %107, %106 : vector<8x512xf32>
    %cst_62 = arith.constant 0.166666672 : f32
    %109 = vector.broadcast %cst_62 : f32 to vector<8x512xf32>
    %110 = arith.mulf %108, %109 : vector<8x512xf32>
    %111 = arith.mulf %102, %110 : vector<8x512xf32>
    %112 = arith.addf %111, %0 : vector<8x512xf32>
    %c0_63 = arith.constant 0 : index
    %c0_64 = arith.constant 0 : index
    %113 = vector.load %arg16[%c0_63, %c0_64] : memref<8x512xf32, #tpu.memory_space<vmem>>, vector<8x512xf32>
    tpu.vector_store %arg16[%c0_63, %c0_64], %112 {strides = array<i32>} : memref<8x512xf32, #tpu.memory_space<vmem>>, vector<8x512xf32>,
    return
  }
  func.func @transform_0(%arg0: i32) -> (i32, i32) {
    %c0_i32 = arith.constant 0 : i32
    %c0_i32_0 = arith.constant 0 : i32
    return %c0_i32, %arg0 : i32, i32
  }
  func.func @transform_1(%arg0: i32) -> (i32, i32) {
    %c0_i32 = arith.constant 0 : i32
    %c0_i32_0 = arith.constant 0 : i32
    %c0_i32_1 = arith.constant 0 : i32
    return %c0_i32, %c0_i32_0 : i32, i32
  }
  func.func @transform_2(%arg0: i32) -> (i32, i32) {
    %c0_i32 = arith.constant 0 : i32
    %c0_i32_0 = arith.constant 0 : i32
    %c0_i32_1 = arith.constant 0 : i32
    return %c0_i32, %c0_i32_0 : i32, i32
  }
  func.func @transform_3(%arg0: i32) -> (i32, i32) {
    %c0_i32 = arith.constant 0 : i32
    %c0_i32_0 = arith.constant 0 : i32
    %c0_i32_1 = arith.constant 0 : i32
    return %c0_i32, %c0_i32_0 : i32, i32
  }
  func.func @transform_4(%arg0: i32) -> (i32, i32) {
    %c0_i32 = arith.constant 0 : i32
    %c0_i32_0 = arith.constant 0 : i32
    %c0_i32_1 = arith.constant 0 : i32
    return %c0_i32, %c0_i32_0 : i32, i32
  }
  func.func @transform_5(%arg0: i32) -> (i32, i32) {
    %c0_i32 = arith.constant 0 : i32
    %c0_i32_0 = arith.constant 0 : i32
    %c0_i32_1 = arith.constant 0 : i32
    return %c0_i32, %c0_i32_0 : i32, i32
  }
  func.func @transform_6(%arg0: i32) -> (i32, i32) {
    %c0_i32 = arith.constant 0 : i32
    %c0_i32_0 = arith.constant 0 : i32
    %c0_i32_1 = arith.constant 0 : i32
    return %c0_i32, %c0_i32_0 : i32, i32
  }
  func.func @transform_7(%arg0: i32) -> (i32, i32) {
    %c0_i32 = arith.constant 0 : i32
    %c0_i32_0 = arith.constant 0 : i32
    %c0_i32_1 = arith.constant 0 : i32
    return %c0_i32, %c0_i32_0 : i32, i32
  }
  func.func @transform_8(%arg0: i32) -> (i32, i32) {
    %c0_i32 = arith.constant 0 : i32
    %c0_i32_0 = arith.constant 0 : i32
    %c0_i32_1 = arith.constant 0 : i32
    return %c0_i32, %c0_i32_0 : i32, i32
  }
  func.func @transform_9(%arg0: i32) -> (i32, i32) {
    %c0_i32 = arith.constant 0 : i32
    %c0_i32_0 = arith.constant 0 : i32
    %c0_i32_1 = arith.constant 0 : i32
    return %c0_i32, %c0_i32_0 : i32, i32
  }
  func.func @transform_10(%arg0: i32) -> (i32, i32) {
    %c0_i32 = arith.constant 0 : i32
    %c0_i32_0 = arith.constant 0 : i32
    %c0_i32_1 = arith.constant 0 : i32
    return %c0_i32, %c0_i32_0 : i32, i32
  }
  func.func @transform_11(%arg0: i32) -> (i32, i32) {
    %c0_i32 = arith.constant 0 : i32
    %c0_i32_0 = arith.constant 0 : i32
    %c0_i32_1 = arith.constant 0 : i32
    return %c0_i32, %c0_i32_0 : i32, i32
  }
  func.func @transform_12(%arg0: i32) -> (i32, i32) {
    %c0_i32 = arith.constant 0 : i32
    %c0_i32_0 = arith.constant 0 : i32
    %c0_i32_1 = arith.constant 0 : i32
    return %c0_i32, %c0_i32_0 : i32, i32
  }
  func.func @transform_13(%arg0: i32) -> (i32, i32) {
    %c0_i32 = arith.constant 0 : i32
    %c0_i32_0 = arith.constant 0 : i32
    %c0_i32_1 = arith.constant 0 : i32
    return %c0_i32, %c0_i32_0 : i32, i32
  }
  func.func @transform_14(%arg0: i32) -> (i32, i32) {
    %c0_i32 = arith.constant 0 : i32
    %c0_i32_0 = arith.constant 0 : i32
    %c0_i32_1 = arith.constant 0 : i32
    return %c0_i32, %c0_i32_0 : i32, i32
  }
  func.func @transform_15(%arg0: i32) -> (i32, i32) {
    %c0_i32 = arith.constant 0 : i32
    %c0_i32_0 = arith.constant 0 : i32
    return %c0_i32, %arg0 : i32, i32
  }
}

</mosaic_0001>

<bundles_post_ra>
// kernel: tpu_custom_call.1
= control target key start
LH: loop header
LB: loop body
LE: loop exit
PB: predicated region body
PF: predicated region fallthrough
CT: control target
= control target key end

     0   :  { %vm69_vm0 = vcmask 64512   ;;  %v2899_v5 = vmov 0.0   ;;  %s2883_s0 = inlined_call_operand.vmem [shape: f32[8,512], index: 0, kind: input, shape index: {}]   ;;  %s2884_s1 = inlined_call_operand.vmem [shape: f32[16,8], index: 1, kind: input, shape index: {}]   ;;  %s2885_s2 = inlined_call_operand.vmem [shape: f32[16,1], index: 2, kind: input, shape index: {}]   ;;  %s2886_s3 = inlined_call_operand.vmem [shape: f32[16,9], index: 3, kind: input, shape index: {}]   ;;  %s2887_s4 = inlined_call_operand.vmem [shape: f32[3,512], index: 4, kind: input, shape index: {}]   ;;  %s2888_s5 = inlined_call_operand.vmem [shape: f32[3,512], index: 5, kind: input, shape index: {}]   ;;  %s2889_s6 = inlined_call_operand.vmem [shape: f32[16,1], index: 6, kind: input, shape index: {}]   ;;  %s2890_s7 = inlined_call_operand.vmem [shape: f32[512,2], index: 7, kind: input, shape index: {}]   ;;  %s2891_s8 = inlined_call_operand.vmem [shape: f32[4,16], index: 8, kind: input, shape index: {}]   ;;  %s2892_s9 = inlined_call_operand.vmem [shape: f32[4,1], index: 9, kind: input, shape index: {}]   ;;  %s2893_s10 = inlined_call_operand.vmem [shape: f32[16,4], index: 10, kind: input, shape index: {}]   ;;  %s2894_s11 = inlined_call_operand.vmem [shape: f32[16,1], index: 11, kind: input, shape index: {}]   ;;  %s2895_s12 = inlined_call_operand.vmem [shape: f32[2,512], index: 12, kind: input, shape index: {}]   ;;  %s2896_s13 = inlined_call_operand.vmem [shape: f32[8,16], index: 13, kind: input, shape index: {}]   ;;  %s2897_s14 = inlined_call_operand.vmem [shape: f32[8,1], index: 14, kind: input, shape index: {}]   ;;  %s2898_s15 = inlined_call_operand.hbm [shape: f32[8,512], index: 15, kind: output, shape index: {}]  }
   0x1   :  { %v52_v0 = vld [vmem:[%s2883_s0 + $0x8] sm:$0xff]  ;;  %v54_v1 = vld [vmem:[%s2883_s0 + $0x18] sm:$0xff]  ;;  %v51_v2 = vld [vmem:[%s2883_s0] sm:$0xff]  ;;  %140 = vmatprep.mubr.f32.mxu0 %v2899_v5  ;;  %217 = vmatprep.mubr.f32.mxu1 %v2899_v5 }
   0x2   :  { %76 = vmatprep.subr.mxu0 %v52_v0  ;;  %153 = vmatprep.subr.mxu1 %v54_v1  ;;  %v53_v3 = vld [vmem:[%s2883_s0 + $0x10] sm:$0xff]  ;;  %v55_v4 = vld [vmem:[%s2884_s1] sm:$0xff] }
   0x3   :  { %77 = vmatpush1.msra.mxu0 %v51_v2  ;;  %154 = vmatpush1.msra.mxu1 %v53_v3 }
   0x4   :  { %20 = vsyncpa [#allocation3], 0  ;;  %1617 = vmatmul.mubr.msk.f32.vlgmr.msra.gmra.mrb[0].mxu0 %vm69_vm0, %v55_v4  ;;  %1619 = vmatmul.mubr.msk.f32.vlgmr.msra.gmra.mrb[0].mxu1 %vm69_vm0, %v55_v4  ;;  %v408_v6 = vld [vmem:[%s2886_s3] sm:$0xff]  ;;  %v56_v8 = vld [vmem:[%s2884_s1 + $0x8] sm:$0xff]  ;;  %v1872_v9 = vmov 3   ;;  %v1873_v10 = vmov 0  }
   0x5   :  { %v57_v7 = vld [vmem:[%s2885_s2] sm:$0xff]  ;;  %146 = vmatprep.mubr.f32.mxu0 %v2899_v5  ;;  %223 = vmatprep.mubr.f32.mxu1 %v2899_v5  ;;  %v58_v11 = vld [vmem:[%s2885_s2 + $0x8] sm:$0xff]  ;;  %v1874_v12 = vmov 1   ;;  %v1875_v14 = vmov 4   ;;  %v1876_v15 = vmov 6   ;;  %v1877_v16 = vmov 5  }
   0x6   :  { %1825 = vset.pattern.permute.xlu1 %v1872_v9  ;;  %1824 = vset.pattern.permute.xlu0 %v1873_v10  ;;  %v409_v13 = vld [vmem:[%s2886_s3 + $0x8] sm:$0xff]  ;;  %v1878_v17 = vmov 2   ;;  %v1879_v18 = vmov 7   ;;  %v1880_v19 = vmov 8   ;;  %v802_v20 = vld [vmem:[%s2889_s6] sm:$0xff]  ;;  %s1881_s22 = smov 16  }
   0x7   :  { %453 = vperm.xlu1 %1825, %v408_v6   ;;  %61 = vperm.xlu0 %1824, %v57_v7   ;;  %s1882_s23 = smov 112   ;;  %s1883_s24 = smov 1   ;;  %v874_v5 = vld [vmem:[%s2890_s7 + $0x1a0] sm:$0xff]  ;;  %vm1886_vm5 = vmmov 0   ;;  %vm1043_vm6 = vcmask 130048   ;;  %vm1132_vm7 = vcmask 31744  }
   0x8   :  { %1618 = vmatmul.mubr.msk.f32.gmra.mrb[2].mxu0 %vm69_vm0, %v56_v8  ;;  %1620 = vmatmul.mubr.msk.f32.gmra.mrb[2].mxu1 %vm69_vm0, %v56_v8  ;;  %s1884_s25 = smov 127   ;;  %vm1139_vm8 = vcmask 1043456   ;;  %vm1252_vm9 = vcmask 1041408   ;;  %vm1245_vm10 = vcmask 15360  }
   0xb   :  { %1826 = vset.pattern.permute.xlu1 %v1874_v12  ;;  %66 = vperm.xlu0 %1824, %v58_v11  }
   0xc   :  { %555 = vperm.xlu1 %1826, %v408_v6  }
   0xf   :  { %1830 = vset.pattern.permute.xlu0 %v1872_v9 }
  0x10   :  { %1827 = vset.pattern.permute.xlu1 %v1875_v14  ;;  %457 = vperm.xlu0 %1830, %v409_v13  }
  0x11   :  { %571 = vperm.xlu1 %1827, %v408_v6  }
  0x14   :  { %1831 = vset.pattern.permute.xlu0 %v1876_v15 }
  0x15   :  { %1828 = vset.pattern.permute.xlu1 %v1877_v16  ;;  %501 = vperm.xlu0 %1831, %v408_v6  }
  0x16   :  { %692 = vperm.xlu1 %1828, %v408_v6  }
  0x19   :  { %505 = vperm.xlu0 %1831, %v409_v13  }
  0x1a   :  { %1829 = vset.pattern.permute.xlu1 %v1873_v10 }
  0x1b   :  { %417 = vperm.xlu1 %1829, %v409_v13  }
  0x1d   :  { %1834 = vset.pattern.permute.xlu0 %v1878_v17 }
  0x1e   :  { %652 = vperm.xlu0 %1834, %v408_v6  }
  0x1f   :  { %1832 = vset.pattern.permute.xlu1 %v1879_v18 }
  0x20   :  { %595 = vperm.xlu1 %1832, %v408_v6  }
  0x22   :  { %656 = vperm.xlu0 %1834, %v409_v13  }
  0x24   :  { %1833 = vset.pattern.permute.xlu1 %v1880_v19 }
  0x25   :  { %740 = vperm.xlu1 %1833, %v408_v6  }
  0x26   :  { %1839 = vset.pattern.permute.xlu0 %v1880_v19 }
  0x27   :  { %744 = vperm.xlu0 %1839, %v409_v13  }
  0x29   :  { %1835 = vset.pattern.permute.xlu1 %v1874_v12 }
  0x2a   :  { %559 = vperm.xlu1 %1835, %v409_v13  }
  0x2b   :  { %1840 = vset.pattern.permute.xlu0 %v1873_v10 }
  0x2c   :  { %412 = vperm.xlu0 %1840, %v408_v6  }
  0x2e   :  { %1836 = vset.pattern.permute.xlu1 %v1875_v14 }
  0x2f   :  { %575 = vperm.xlu1 %1836, %v409_v13  }
  0x30   :  { %806 = vperm.xlu0 %1840, %v802_v20  }
  0x33   :  { %1837 = vset.pattern.permute.xlu1 %v1877_v16 }
  0x34   :  { %696 = vperm.xlu1 %1837, %v409_v13  }
  0x38   :  { %1838 = vset.pattern.permute.xlu1 %v1879_v18 }
  0x39   :  { %599 = vperm.xlu1 %1838, %v409_v13  }
  0x3d   :  { %1841 = vset.pattern.permute.xlu1 %v1873_v10 }
  0x86   :  { %v2010_v21 = vpop.permute.xlu1 %453  ;;  %v62_v27 = vpop.permute.xlu0 %61 }
  0x8a   :  { %v67_v37 = vpop.permute.xlu0 %66 }
  0x8b   :  { %v2012_v22 = vpop.permute.xlu1 %555 }
  0x90   :  { %v2014_v23 = vpop.permute.xlu1 %571 }
  0x95   :  { %v2016_v24 = vpop.permute.xlu1 %692 }
  0x9a   :  { %v2018_v25 = vpop.permute.xlu1 %417 }
  0x9f   :  { %v2020_v26 = vpop.permute.xlu1 %595 }
  0xa4   :  { %v2022_v36 = vpop.permute.xlu1 %740 }
  0xa9   :  { %v2024_v61 = vpop.permute.xlu1 %559 }
  0xae   :  { %v576_v17 = vpop.permute.xlu1 %575 }
  0xd7   :  { %v142_v28 = vpop.f32.mrb[0].mxu0  ;;  %v219_v29 = vpop.f32.mrb[0].mxu1 }
  0xd8   :  { %v143_v30 = vadd.f32 %v142_v28, %v62_v27  ;;  %v220_v31 = vadd.f32 %v219_v29, %v62_v27  ;;  %v144_v32 = vpop.f32.mrb[1].mxu0  ;;  %v221_v33 = vpop.f32.mrb[1].mxu1 }
  0xd9   :  { %v145_v34 = vadd.f32 %v144_v32, %v62_v27  ;;  %v222_v35 = vadd.f32 %v221_v33, %v62_v27 }
  0xda   :  { %v230_v38 = vadd.f32 3.0, %v143_v30  ;;  %v232_v39 = vadd.f32 3.0, %v220_v31 }
  0xdb   :  { %v231_v40 = vadd.f32 3.0, %v145_v34  ;;  %v233_v41 = vadd.f32 3.0, %v222_v35  ;;  %v148_v42 = vpop.f32.mrb[2].mxu0  ;;  %v225_v43 = vpop.f32.mrb[2].mxu1 }
  0xdc   :  { %v238_v44 = vmax.f32 %v230_v38, 0.0  ;;  %v240_v45 = vmax.f32 %v232_v39, 0.0  ;;  %v149_v46 = vadd.f32 %v148_v42, %v67_v37  ;;  %v226_v47 = vadd.f32 %v225_v43, %v67_v37  ;;  %v150_v48 = vpop.f32.mrb[3].mxu0  ;;  %v227_v49 = vpop.f32.mrb[3].mxu1 }
  0xdd   :  { %v239_v50 = vmax.f32 %v231_v40, 0.0  ;;  %v241_v51 = vmax.f32 %v233_v41, 0.0  ;;  %v151_v52 = vadd.f32 %v150_v48, %v67_v37  ;;  %v228_v53 = vadd.f32 %v227_v49, %v67_v37  ;;  %v2094_v42 = vpop.permute.xlu1 %696 }
  0xde   :  { %v246_v54 = vmin.f32 %v238_v44, 6.0  ;;  %v248_v55 = vmin.f32 %v240_v45, 6.0  ;;  %v234_v56 = vadd.f32 3.0, %v149_v46  ;;  %v236_v57 = vadd.f32 3.0, %v226_v47 }
  0xdf   :  { %v247_v58 = vmin.f32 %v239_v50, 6.0  ;;  %v235_v59 = vadd.f32 3.0, %v151_v52  ;;  %v237_v60 = vadd.f32 3.0, %v228_v53  ;;  %v249_v3 = vmin.f32 %v241_v51, 6.0 }
  0xe0   :  { %v254_v62 = vmul.f32 0.16666667, %v246_v54  ;;  %v256_v63 = vmul.f32 0.16666667, %v248_v55  ;;  %v242_v0 = vmax.f32 %v234_v56, 0.0  ;;  %v244_v1 = vmax.f32 %v236_v57, 0.0 }
  0xe1   :  { %v255_v2 = vmul.f32 0.16666667, %v247_v58  ;;  %v243_v4 = vmax.f32 %v235_v59, 0.0  ;;  %v245_v6 = vmax.f32 %v237_v60, 0.0  ;;  %v257_v19 = vmul.f32 0.16666667, %v249_v3  ;;  %v2098_v45 = vpop.permute.xlu1 %599 }
  0xe2   :  { %v2026_v7 = vmul.f32 %v254_v62, %v143_v30  ;;  %v2028_v8 = vmul.f32 %v256_v63, %v220_v31  ;;  %v250_v9 = vmin.f32 %v242_v0, 6.0  ;;  %v252_v10 = vmin.f32 %v244_v1, 6.0  ;;  %v297_v51 = vld [vmem:[%s2887_s4] ss:$4 sm:$0xf] }
  0xe3   :  { %v251_v11 = vmin.f32 %v243_v4, 6.0  ;;  %v253_v12 = vmin.f32 %v245_v6, 6.0  ;;  %v2034_v18 = vmul.f32 %v255_v2, %v145_v34  ;;  %v2047_v34 = vmul.f32 %v257_v19, %v222_v35  ;;  %v2082_v35 = vpop.permute.xlu0 %457  ;;  %v1621_v60 = vld [vmem:[%s2887_s4 + $0x2] ss:$4 sm:$0xf] }
  0xe4   :  { %v258_v13 = vmul.f32 0.16666667, %v250_v9  ;;  %v260_v14 = vmul.f32 0.16666667, %v252_v10  ;;  %278 = vrot.lane.b32.xlu0 %v2028_v8, %s1881_s22  ;;  %270 = vrot.lane.b32.xlu1 %v2026_v7, %s1881_s22  ;;  %v286_v44 = vlaneseq  ;;  %v580_v63 = vmul.f32 %v2014_v23, %v2028_v8  ;;  %v871_v9 = vld [vmem:[%s2890_s7 + $0x188] sm:$0xff] }
  0xe5   :  { %v259_v15 = vmul.f32 0.16666667, %v251_v11  ;;  %v261_v16 = vmul.f32 0.16666667, %v253_v12  ;;  %v579_v62 = vmul.f32 %v2014_v23, %v2034_v18  ;;  %v581_v10 = vmul.f32 %v2014_v23, %v2047_v34 }
  0xe6   :  { %v266_v20 = vmul.f32 %v258_v13, %v149_v46  ;;  %v268_v27 = vmul.f32 %v260_v14, %v226_v47  ;;  %v2102_v47 = vshrl.u32 %v286_v44, 7  ;;  %v2104_v48 = vand.u32 127, %v286_v44  ;;  %v838_v13 = vld [vmem:[%s2890_s7 + $0x80] sm:$0xff]  ;;  %v839_v14 = vld [vmem:[%s2890_s7 + $0x88] sm:$0xff] }
  0xe7   :  { %v267_v28 = vmul.f32 %v259_v15, %v151_v52  ;;  %v269_v29 = vmul.f32 %v261_v16, %v228_v53  ;;  %v2084_v37 = vpop.permute.xlu0 %501  ;;  %v854_v15 = vld [vmem:[%s2890_s7 + $0x100] sm:$0xff] }
  0xe8   :  { %v2036_v30 = vmul.f32 %v576_v17, %v266_v20  ;;  %v2038_v31 = vmul.f32 %v576_v17, %v268_v27  ;;  %327 = vrot.lane.b32.xlu0 %v2026_v7, %s1882_s23  ;;  %274 = vrot.lane.b32.xlu1 %v2034_v18, %s1881_s22  ;;  %2904 = vst [vmem:[#allocation6_spill] sm:$0xff] %v2102_v47  ;;  %v2107_v49 = vsub.s32 1, %v2102_v47  ;;  %v2110_v50 = vsub.s32 2, %v2102_v47 }
  0xe9   :  { %v2043_v32 = vmul.f32 %v576_v17, %v267_v28  ;;  %v2045_v33 = vmul.f32 %v576_v17, %v269_v29  ;;  %vm288_vm1 = vcmp.lt.s32.totalorder %v2104_v48, 16  ;;  %v2123_v56 = vsub.s32 0, %v2102_v47 }
  0xea   :  { %v2117_v54 = vrot.slane %v297_v51, %v2107_v49  ;;  %v2120_v55 = vrot.slane %v297_v51, %v2110_v50  ;;  %v2126_v57 = vsub.s32 3, %v2102_v47  ;;  %vm343_vm2 = vcmp.lt.s32.totalorder %v2104_v48, 112 }
  0xeb   :  { %v2086_v38 = vpop.permute.xlu0 %505  ;;  %v2148_v4 = vrot.slane %v297_v51, %v2123_v56  ;;  %v2163_v11 = vrot.slane %v1621_v60, %v2123_v56  ;;  %vm399_vm3 = vcmp.lt.s32.totalorder %v2104_v48, 1  ;;  %vm642_vm4 = vcmp.lt.s32.totalorder %v2104_v48, 127 }
  0xec   :  { %335 = vrot.lane.b32.xlu0 %v2028_v8, %s1882_s23  ;;  %282 = vrot.lane.b32.xlu1 %v2047_v34, %s1881_s22  ;;  %v2151_v6 = vrot.slane %v297_v51, %v2126_v57 }
  0xef   :  { %v2088_v39 = vpop.permute.xlu0 %652 }
  0xf0   :  { %428 = vrot.lane.b32.xlu0 %v2026_v7, %s1883_s24  ;;  %331 = vrot.lane.b32.xlu1 %v2034_v18, %s1882_s23 }
  0xf3   :  { %v2090_v40 = vpop.permute.xlu0 %656 }
  0xf4   :  { %436 = vrot.lane.b32.xlu0 %v2028_v8, %s1883_s24  ;;  %339 = vrot.lane.b32.xlu1 %v2047_v34, %s1882_s23 }
  0xf7   :  { %v2092_v41 = vpop.permute.xlu0 %744 }
  0xf8   :  { %667 = vrot.lane.b32.xlu0 %v2026_v7, %s1884_s25  ;;  %432 = vrot.lane.b32.xlu1 %v2034_v18, %s1883_s24  ;;  %2903 = vst [vmem:[#allocation5_spill] sm:$0xff] %v2092_v41 }
  0xfb   :  { %v2096_v43 = vpop.permute.xlu0 %412 }
  0xfc   :  { %675 = vrot.lane.b32.xlu0 %v2028_v8, %s1884_s25  ;;  %440 = vrot.lane.b32.xlu1 %v2047_v34, %s1883_s24  ;;  %v870_v8 = vld [vmem:[%s2890_s7 + $0x180] sm:$0xff] }
  0xfd   :  { %v1763_v12 = vpack.c.bf16 %v871_v9, %v870_v8 }
  0xff   :  { %v2100_v46 = vpop.permute.xlu0 %806  ;;  %1764 = vmatprep.subr.bf16.mxu1 %v1763_v12 }
 0x100   :  { %272 = vrot.lane.b32.xlu0 %v266_v20, %s1881_s22  ;;  %671 = vrot.lane.b32.xlu1 %v2034_v18, %s1884_s25 }
 0x104   :  { %280 = vrot.lane.b32.xlu0 %v268_v27, %s1881_s22  ;;  %679 = vrot.lane.b32.xlu1 %v2047_v34, %s1884_s25  ;;  %v823_v34 = vld [vmem:[%s2890_s7 + $0x8] sm:$0xff] }
 0x108   :  { %329 = vrot.lane.b32.xlu0 %v266_v20, %s1882_s23  ;;  %276 = vrot.lane.b32.xlu1 %v267_v28, %s1881_s22 }
 0x10c   :  { %337 = vrot.lane.b32.xlu0 %v268_v27, %s1882_s23  ;;  %284 = vrot.lane.b32.xlu1 %v269_v29, %s1881_s22 }
 0x110   :  { %430 = vrot.lane.b32.xlu0 %v266_v20, %s1883_s24  ;;  %333 = vrot.lane.b32.xlu1 %v267_v28, %s1882_s23 }
 0x114   :  { %438 = vrot.lane.b32.xlu0 %v268_v27, %s1883_s24  ;;  %341 = vrot.lane.b32.xlu1 %v269_v29, %s1882_s23 }
 0x118   :  { %669 = vrot.lane.b32.xlu0 %v266_v20, %s1884_s25  ;;  %434 = vrot.lane.b32.xlu1 %v267_v28, %s1883_s24  ;;  %v2183_v20 = vrot.slane %v1621_v60, %v2107_v49 }
 0x11c   :  { %677 = vrot.lane.b32.xlu0 %v268_v27, %s1884_s25  ;;  %442 = vrot.lane.b32.xlu1 %v269_v29, %s1883_s24  ;;  %v1731_v27 = vpack.c.bf16 %v839_v14, %v838_v13  ;;  %v840_v14 = vld [vmem:[%s2890_s7 + $0x90] sm:$0xff] }
 0x11e   :  { %1732 = vmatprep.subr.bf16.mxu0 %v1731_v27  ;;  %v2237_v27 = vrot.slane %v1621_v60, %v2126_v57 }
 0x120   :  { %673 = vrot.lane.b32.xlu1 %v267_v28, %s1884_s25  ;;  %v855_v28 = vld [vmem:[%s2890_s7 + $0x108] sm:$0xff] }
 0x124   :  { %681 = vrot.lane.b32.xlu1 %v269_v29, %s1884_s25  ;;  %v822_v29 = vld [vmem:[%s2890_s7] sm:$0xff] }
 0x156   :  { %v279_v52 = vpop.permute.xlu0 %278  ;;  %v271_v53 = vpop.permute.xlu1 %270 }
 0x15a   :  { %v2128_v58 = vpop.permute.xlu0 %327  ;;  %v275_v59 = vpop.permute.xlu1 %274 }
 0x15b   :  { %v291_v0 = vsel %vm288_vm1, %v275_v59, %v279_v52  ;;  %v293_v1 = vsel %vm288_vm1, %v271_v53, %v275_v59  ;;  %v1765_v59 = vpack.c.bf16 %v855_v28, %v854_v15  ;;  %v841_v15 = vld [vmem:[%s2890_s7 + $0x98] sm:$0xff] }
 0x15c   :  { %v2142_v2 = vmul.f32 %v2117_v54, %v293_v1  ;;  %v2145_v3 = vmul.f32 %v2120_v55, %v291_v0  ;;  %v1733_v0 = vpack.c.bf16 %v823_v34, %v822_v29  ;;  %v857_v28 = vld [vmem:[%s2890_s7 + $0x118] sm:$0xff] }
 0x15d   :  { %1766 = vmatpush3.bf16.msra.mxu1 %v1765_v59 }
 0x15e   :  { %v563_v16 = vmul.f32 %v2012_v22, %v2142_v2  ;;  %v564_v17 = vmul.f32 %v2012_v22, %v2145_v3  ;;  %v2178_v18 = vpop.permute.xlu0 %335  ;;  %387 = vrot.lane.b32.xlu1 %v2142_v2, %s1883_s24  ;;  %v283_v19 = vpop.permute.xlu1 %282  ;;  %1734 = vmatpush3.bf16.msra.mxu0 %v1733_v0 }
 0x15f   :  { %v289_v44 = vsel %vm288_vm1, %v279_v52, %v283_v19  ;;  %v295_v51 = vsel %vm288_vm1, %v283_v19, %v271_v53  ;;  %v872_v52 = vld [vmem:[%s2890_s7 + $0x190] sm:$0xff]  ;;  %v873_v53 = vld [vmem:[%s2890_s7 + $0x198] sm:$0xff] }
 0x160   :  { %v587_v1 = vadd.f32 %v579_v62, %v563_v16  ;;  %v2198_v8 = vadd.f32 %v580_v63, %v564_v17  ;;  %v2201_v9 = vmul.f32 %v2148_v4, %v295_v51  ;;  %v2204_v13 = vmul.f32 %v2151_v6, %v289_v44  ;;  %v856_v16 = vld [vmem:[%s2890_s7 + $0x110] sm:$0xff]  ;;  %v825_v51 = vld [vmem:[%s2890_s7 + $0x18] sm:$0xff] }
 0x161   :  { %v578_v62 = vmul.f32 %v2014_v23, %v2026_v7  ;;  %v2215_v63 = vrot.slane %v1621_v60, %v2110_v50  ;;  %v1767_v12 = vpack.c.bf16 %v873_v53, %v872_v52  ;;  %v1735_v44 = vpack.c.bf16 %v841_v15, %v840_v14  ;;  %v858_v15 = vld [vmem:[%s2890_s7 + $0x120] sm:$0xff] }
 0x162   :  { %v562_v23 = vmul.f32 %v2012_v22, %v2201_v9  ;;  %v565_v7 = vmul.f32 %v2012_v22, %v2204_v13  ;;  %v2230_v17 = vpop.permute.xlu0 %428  ;;  %383 = vrot.lane.b32.xlu0 %v2201_v9, %s1883_s24  ;;  %395 = vrot.lane.b32.xlu1 %v2204_v13, %s1883_s24  ;;  %v332_v19 = vpop.permute.xlu1 %331  ;;  %v824_v22 = vld [vmem:[%s2890_s7 + $0x10] sm:$0xff]  ;;  %v1769_v60 = vpack.c.bf16 %v857_v28, %v856_v16 }
 0x163   :  { %v346_v29 = vsel %vm343_vm2, %v332_v19, %v2178_v18  ;;  %v348_v34 = vsel %vm343_vm2, %v2128_v58, %v332_v19  ;;  %1768 = vmatprep.subr.bf16.mxu1 %v1767_v12  ;;  %v875_v12 = vld [vmem:[%s2890_s7 + $0x1a8] sm:$0xff]  ;;  %1736 = vmatprep.subr.bf16.mxu0 %v1735_v44  ;;  %v1737_v14 = vpack.c.bf16 %v825_v51, %v824_v22 }
 0x164   :  { %v586_v59 = vadd.f32 %v578_v62, %v562_v23  ;;  %v589_v0 = vadd.f32 %v581_v10, %v565_v7  ;;  %v2255_v52 = vmul.f32 %v2163_v11, %v348_v34  ;;  %v2258_v53 = vmul.f32 %v2183_v20, %v346_v29  ;;  %1770 = vmatpush3.bf16.msra.mxu1 %v1769_v60  ;;  %v842_v10 = vld [vmem:[%s2890_s7 + $0xa0] sm:$0xff]  ;;  %v843_v62 = vld [vmem:[%s2890_s7 + $0xa8] sm:$0xff] }
 0x165   :  { %v1771_v28 = vpack.c.bf16 %v875_v12, %v874_v5  ;;  %v859_v22 = vld [vmem:[%s2890_s7 + $0x128] sm:$0xff]  ;;  %v826_v29 = vld [vmem:[%s2890_s7 + $0x20] sm:$0xff]  ;;  %1738 = vmatpush3.bf16.msra.mxu0 %v1737_v14  ;;  %v1739_v60 = vpack.c.bf16 %v843_v62, %v842_v10  ;;  %v877_v14 = vld [vmem:[%s2890_s7 + $0x1b8] sm:$0xff] }
 0x166   :  { %v602_v16 = vmul.f32 %v2020_v26, %v2255_v52  ;;  %v603_v23 = vmul.f32 %v2020_v26, %v2258_v53  ;;  %v437_v7 = vpop.permute.xlu0 %436  ;;  %391 = vrot.lane.b32.xlu0 %v2145_v3, %s1883_s24  ;;  %476 = vrot.lane.b32.xlu1 %v2255_v52, %s1883_s24  ;;  %v340_v19 = vpop.permute.xlu1 %339  ;;  %v1773_v51 = vpack.c.bf16 %v859_v22, %v858_v15  ;;  %v827_v5 = vld [vmem:[%s2890_s7 + $0x28] sm:$0xff]  ;;  %v844_v10 = vld [vmem:[%s2890_s7 + $0xb0] sm:$0xff] }
 0x167   :  { %v344_v34 = vsel %vm343_vm2, %v2178_v18, %v340_v19  ;;  %v350_v44 = vsel %vm343_vm2, %v340_v19, %v2128_v58  ;;  %1772 = vmatprep.subr.bf16.mxu1 %v1771_v28  ;;  %v876_v58 = vld [vmem:[%s2890_s7 + $0x1b0] sm:$0xff]  ;;  %1740 = vmatprep.subr.bf16.mxu0 %v1739_v60  ;;  %v845_v62 = vld [vmem:[%s2890_s7 + $0xb8] sm:$0xff] }
 0x168   :  { %v2299_v12 = vadd.f32 %v602_v16, %v586_v59  ;;  %v2301_v47 = vadd.f32 %v603_v23, %v587_v1  ;;  %v2304_v41 = vmul.f32 %v2215_v63, %v344_v34  ;;  %v2307_v18 = vmul.f32 %v2237_v27, %v350_v44  ;;  %1774 = vmatpush3.bf16.msra.mxu1 %v1773_v51  ;;  %v860_v15 = vld [vmem:[%s2890_s7 + $0x130] sm:$0xff]  ;;  %v829_v51 = vld [vmem:[%s2890_s7 + $0x38] sm:$0xff] }
 0x169   :  { %v1741_v59 = vpack.c.bf16 %v827_v5, %v826_v29  ;;  %v1775_v1 = vpack.c.bf16 %v877_v14, %v876_v58  ;;  %v1743_v22 = vpack.c.bf16 %v845_v62, %v844_v10  ;;  %v861_v29 = vld [vmem:[%s2890_s7 + $0x138] sm:$0xff]  ;;  %v828_v34 = vld [vmem:[%s2890_s7 + $0x30] sm:$0xff]  ;;  %v878_v14 = vld [vmem:[%s2890_s7 + $0x1c0] sm:$0xff] }
 0x16a   :  { %v604_v16 = vmul.f32 %v2020_v26, %v2304_v41  ;;  %v605_v23 = vmul.f32 %v2020_v26, %v2307_v18  ;;  %v2328_v19 = vpop.permute.xlu0 %667  ;;  %480 = vrot.lane.b32.xlu0 %v2258_v53, %s1883_s24  ;;  %484 = vrot.lane.b32.xlu1 %v2304_v41, %s1883_s24  ;;  %v433_v28 = vpop.permute.xlu1 %432  ;;  %v1777_v60 = vpack.c.bf16 %v861_v29, %v860_v15  ;;  %v846_v62 = vld [vmem:[%s2890_s7 + $0xc0] sm:$0xff] }
 0x16b   :  { %v2342_v26 = vsel %vm399_vm3, %v433_v28, %v437_v7  ;;  %v2347_v44 = vsel %vm399_vm3, %v2230_v17, %v433_v28  ;;  %1742 = vmatpush3.bf16.msra.mxu0 %v1741_v59  ;;  %1776 = vmatprep.subr.bf16.mxu1 %v1775_v1  ;;  %v879_v59 = vld [vmem:[%s2890_s7 + $0x1c8] sm:$0xff]  ;;  %v1745_v1 = vpack.c.bf16 %v829_v51, %v828_v34 }
 0x16c   :  { %v2353_v5 = vadd.f32 %v604_v16, %v2198_v8  ;;  %v2355_v58 = vadd.f32 %v605_v23, %v589_v0  ;;  %1744 = vmatprep.subr.bf16.mxu0 %v1743_v22  ;;  %1778 = vmatpush3.bf16.msra.mxu1 %v1777_v60  ;;  %v1779_v10 = vpack.c.bf16 %v879_v59, %v878_v14  ;;  %v847_v8 = vld [vmem:[%s2890_s7 + $0xc8] sm:$0xff]  ;;  %v862_v0 = vld [vmem:[%s2890_s7 + $0x140] sm:$0xff]  ;;  %v848_v59 = vld [vmem:[%s2890_s7 + $0xd0] sm:$0xff] }
 0x16d   :  { %v1747_v23 = vpack.c.bf16 %v847_v8, %v846_v62  ;;  %v863_v28 = vld [vmem:[%s2890_s7 + $0x148] sm:$0xff]  ;;  %v830_v22 = vld [vmem:[%s2890_s7 + $0x40] sm:$0xff] }
 0x16e   :  { %v676_v15 = vpop.permute.xlu0 %675  ;;  %488 = vrot.lane.b32.xlu0 %v2307_v18, %s1883_s24  ;;  %630 = vrot.lane.b32.xlu1 %v2142_v2, %s1884_s25  ;;  %v441_v16 = vpop.permute.xlu1 %440  ;;  %v1781_v2 = vpack.c.bf16 %v863_v28, %v862_v0  ;;  %v831_v60 = vld [vmem:[%s2890_s7 + $0x48] sm:$0xff] }
 0x16f   :  { %v2384_v29 = vsel %vm399_vm3, %v437_v7, %v441_v16  ;;  %v2389_v34 = vsel %vm399_vm3, %v441_v16, %v2230_v17  ;;  %1746 = vmatpush3.bf16.msra.mxu0 %v1745_v1  ;;  %1780 = vmatprep.subr.bf16.mxu1 %v1779_v10  ;;  %v1749_v51 = vpack.c.bf16 %v831_v60, %v830_v22  ;;  %v880_v7 = vld [vmem:[%s2890_s7 + $0x1d0] sm:$0xff]  ;;  %v881_v17 = vld [vmem:[%s2890_s7 + $0x1d8] sm:$0xff]  ;;  %v882_v60 = vld [vmem:[%s2890_s7 + $0x1e0] sm:$0xff] }
 0x170   :  { %1748 = vmatprep.subr.bf16.mxu0 %v1747_v23  ;;  %1782 = vmatpush3.bf16.msra.mxu1 %v1781_v2  ;;  %v1783_v14 = vpack.c.bf16 %v881_v17, %v880_v7  ;;  %v849_v1 = vld [vmem:[%s2890_s7 + $0xd8] sm:$0xff]  ;;  %v864_v10 = vld [vmem:[%s2890_s7 + $0x150] sm:$0xff]  ;;  %v883_v7 = vld [vmem:[%s2890_s7 + $0x1e8] sm:$0xff] }
 0x171   :  { %v1751_v0 = vpack.c.bf16 %v849_v1, %v848_v59  ;;  %v865_v16 = vld [vmem:[%s2890_s7 + $0x158] sm:$0xff]  ;;  %v832_v23 = vld [vmem:[%s2890_s7 + $0x50] sm:$0xff]  ;;  %v1787_v17 = vpack.c.bf16 %v883_v7, %v882_v60  ;;  %v866_v59 = vld [vmem:[%s2890_s7 + $0x160] sm:$0xff] }
 0x172   :  { %v2410_v62 = vpop.permute.xlu0 %272  ;;  %626 = vrot.lane.b32.xlu0 %v2201_v9, %s1884_s25  ;;  %638 = vrot.lane.b32.xlu1 %v2204_v13, %s1884_s25  ;;  %v672_v8 = vpop.permute.xlu1 %671  ;;  %v833_v13 = vld [vmem:[%s2890_s7 + $0x58] sm:$0xff]  ;;  %v1785_v22 = vpack.c.bf16 %v865_v16, %v864_v10  ;;  %v834_v16 = vld [vmem:[%s2890_s7 + $0x60] sm:$0xff] }
 0x173   :  { %v2424_v28 = vsel %vm642_vm4, %v672_v8, %v676_v15  ;;  %v2429_v9 = vsel %vm642_vm4, %v2328_v19, %v672_v8  ;;  %1750 = vmatpush3.bf16.msra.mxu0 %v1749_v51  ;;  %1784 = vmatprep.subr.bf16.mxu1 %v1783_v14  ;;  %v1753_v2 = vpack.c.bf16 %v833_v13, %v832_v23  ;;  %v850_v51 = vld [vmem:[%s2890_s7 + $0xe0] sm:$0xff]  ;;  %v851_v14 = vld [vmem:[%s2890_s7 + $0xe8] sm:$0xff]  ;;  %v885_v7 = vld [vmem:[%s2890_s7 + $0x1f8] sm:$0xff] }
 0x174   :  { %1752 = vmatprep.subr.bf16.mxu0 %v1751_v0  ;;  %v1755_v8 = vpack.c.bf16 %v851_v14, %v850_v51  ;;  %v867_v0 = vld [vmem:[%s2890_s7 + $0x168] sm:$0xff]  ;;  %1786 = vmatpush3.bf16.msra.mxu1 %v1785_v22  ;;  %v852_v22 = vld [vmem:[%s2890_s7 + $0xf0] sm:$0xff] }
 0x175   :  { %v835_v13 = vld [vmem:[%s2890_s7 + $0x68] sm:$0xff]  ;;  %1788 = vmatprep.subr.bf16.mxu1 %v1787_v17  ;;  %v868_v17 = vld [vmem:[%s2890_s7 + $0x170] sm:$0xff] }
 0x176   :  { %v281_v1 = vpop.permute.xlu0 %280  ;;  %634 = vrot.lane.b32.xlu0 %v2145_v3, %s1884_s25  ;;  %719 = vrot.lane.b32.xlu1 %v2258_v53, %s1884_s25  ;;  %v680_v10 = vpop.permute.xlu1 %679  ;;  %v1789_v53 = vpack.c.bf16 %v867_v0, %v866_v59  ;;  %v1757_v60 = vpack.c.bf16 %v835_v13, %v834_v16  ;;  %v837_v16 = vld [vmem:[%s2890_s7 + $0x78] sm:$0xff] }
 0x177   :  { %v2461_v23 = vsel %vm642_vm4, %v676_v15, %v680_v10  ;;  %v2466_v3 = vsel %vm642_vm4, %v680_v10, %v2328_v19  ;;  %1754 = vmatpush3.bf16.msra.mxu0 %v1753_v2  ;;  %v884_v15 = vld [vmem:[%s2890_s7 + $0x1f0] sm:$0xff]  ;;  %v853_v2 = vld [vmem:[%s2890_s7 + $0xf8] sm:$0xff] }
 0x178   :  { %1756 = vmatprep.subr.bf16.mxu0 %v1755_v8  ;;  %v1791_v19 = vpack.c.bf16 %v885_v7, %v884_v15  ;;  %v1759_v59 = vpack.c.bf16 %v853_v2, %v852_v22  ;;  %v869_v10 = vld [vmem:[%s2890_s7 + $0x178] sm:$0xff]  ;;  %v836_v8 = vld [vmem:[%s2890_s7 + $0x70] sm:$0xff]  ;;  %1790 = vmatpush3.bf16.msra.mxu1 %v1789_v53 }
 0x179   :  { %v1761_v7 = vpack.c.bf16 %v837_v16, %v836_v8 }
 0x17a   :  { %v330_v51 = vpop.permute.xlu0 %329  ;;  %715 = vrot.lane.b32.xlu0 %v2255_v52, %s1884_s25  ;;  %727 = vrot.lane.b32.xlu1 %v2307_v18, %s1884_s25  ;;  %v277_v14 = vpop.permute.xlu1 %276  ;;  %v1793_v18 = vpack.c.bf16 %v869_v10, %v868_v17 }
 0x17b   :  { %v292_v0 = vsel %vm288_vm1, %v277_v14, %v281_v1  ;;  %v294_v52 = vsel %vm288_vm1, %v2410_v62, %v277_v14  ;;  %1758 = vmatpush3.bf16.msra.mxu0 %v1757_v60  ;;  %1792 = vmatprep.subr.bf16.mxu1 %v1791_v19 }
 0x17c   :  { %v2505_v13 = vmul.f32 %v2117_v54, %v294_v52  ;;  %v325_v15 = vmul.f32 %v2120_v55, %v292_v0  ;;  %1760 = vmatprep.subr.bf16.mxu0 %v1759_v59  ;;  %1794 = vmatpush3.bf16.msra.mxu1 %v1793_v18 }
 0x17e   :  { %v567_v22 = vmul.f32 %v2024_v61, %v2505_v13  ;;  %v568_v2 = vmul.f32 %v2024_v61, %v325_v15  ;;  %v338_v53 = vpop.permute.xlu0 %337  ;;  %723 = vrot.lane.b32.xlu0 %v2304_v41, %s1884_s25  ;;  %v285_v60 = vpop.permute.xlu1 %284 }
 0x17f   :  { %v290_v17 = vsel %vm288_vm1, %v281_v1, %v285_v60  ;;  %v296_v54 = vsel %vm288_vm1, %v285_v60, %v2410_v62  ;;  %1762 = vmatpush3.bf16.msra.mxu0 %v1761_v7 }
 0x180   :  { %v591_v55 = vadd.f32 %v2043_v32, %v567_v22  ;;  %v592_v19 = vadd.f32 %v2038_v31, %v568_v2  ;;  %v323_v14 = vmul.f32 %v2148_v4, %v296_v54  ;;  %v326_v59 = vmul.f32 %v2151_v6, %v290_v17 }
 0x182   :  { %v566_v41 = vmul.f32 %v2024_v61, %v323_v14  ;;  %v569_v10 = vmul.f32 %v2024_v61, %v326_v59  ;;  %v431_v8 = vpop.permute.xlu0 %430  ;;  %393 = vrot.lane.b32.xlu0 %v325_v15, %s1883_s24  ;;  %385 = vrot.lane.b32.xlu1 %v323_v14, %s1883_s24  ;;  %v334_v62 = vpop.permute.xlu1 %333 }
 0x183   :  { %v347_v1 = vsel %vm343_vm2, %v334_v62, %v338_v53  ;;  %v349_v31 = vsel %vm343_vm2, %v330_v51, %v334_v62 }
 0x184   :  { %v590_v32 = vadd.f32 %v2036_v30, %v566_v41  ;;  %v593_v4 = vadd.f32 %v2045_v33, %v569_v10  ;;  %v379_v6 = vmul.f32 %v2163_v11, %v349_v31  ;;  %v380_v61 = vmul.f32 %v2183_v20, %v347_v1  ;;  %v803_v31 = vld [vmem:[%s2889_s6 + $0x8] sm:$0xff] }
 0x186   :  { %v606_v0 = vmul.f32 %v2098_v45, %v379_v6  ;;  %v607_v52 = vmul.f32 %v2098_v45, %v380_v61  ;;  %v439_v18 = vpop.permute.xlu0 %438  ;;  %389 = vrot.lane.b32.xlu1 %v2505_v13, %s1883_s24  ;;  %478 = vrot.lane.b32.xlu0 %v379_v6, %s1883_s24  ;;  %v342_v16 = vpop.permute.xlu1 %341 }
 0x187   :  { %v345_v30 = vsel %vm343_vm2, %v338_v53, %v342_v16  ;;  %v351_v33 = vsel %vm343_vm2, %v342_v16, %v330_v51  ;;  %v460_v16 = vmul.f32 %v2010_v21, %v2389_v34  ;;  %v463_v34 = vmul.f32 %v2010_v21, %v2384_v29 }
 0x188   :  { %v2543_v11 = vadd.f32 %v606_v0, %v590_v32  ;;  %v2545_v20 = vadd.f32 %v607_v52, %v591_v55  ;;  %v381_v7 = vmul.f32 %v2215_v63, %v345_v30  ;;  %v382_v22 = vmul.f32 %v2237_v27, %v351_v33  ;;  %v1424_v32 = vld [vmem:[%s2897_s14] sm:$0xff] }
 0x18a   :  { %v608_v2 = vmul.f32 %v2098_v45, %v381_v7  ;;  %v609_v60 = vmul.f32 %v2098_v45, %v382_v22  ;;  %397 = vrot.lane.b32.xlu1 %v326_v59, %s1883_s24  ;;  %486 = vrot.lane.b32.xlu0 %v381_v7, %s1883_s24  ;;  %v435_v53 = vpop.permute.xlu1 %434  ;;  %v670_v54 = vpop.permute.xlu0 %669 }
 0x18b   :  { %v2555_v51 = vsel %vm399_vm3, %v435_v53, %v439_v18  ;;  %v2559_v17 = vsel %vm399_vm3, %v431_v8, %v435_v53 }
 0x18c   :  { %v2561_v63 = vadd.f32 %v608_v2, %v592_v19  ;;  %v2563_v27 = vadd.f32 %v609_v60, %v593_v4 }
 0x18e   :  { %482 = vrot.lane.b32.xlu1 %v380_v61, %s1883_s24  ;;  %628 = vrot.lane.b32.xlu0 %v323_v14, %s1884_s25  ;;  %v443_v45 = vpop.permute.xlu1 %442  ;;  %v678_v10 = vpop.permute.xlu0 %677 }
 0x18f   :  { %v2569_v55 = vsel %vm399_vm3, %v439_v18, %v443_v45  ;;  %v2573_v41 = vsel %vm399_vm3, %v443_v45, %v431_v8 }
 0x192   :  { %490 = vrot.lane.b32.xlu1 %v382_v22, %s1883_s24  ;;  %636 = vrot.lane.b32.xlu0 %v325_v15, %s1884_s25  ;;  %v674_v19 = vpop.permute.xlu1 %673 }
 0x193   :  { %v2579_v62 = vsel %vm642_vm4, %v674_v19, %v678_v10  ;;  %v2583_v14 = vsel %vm642_vm4, %v670_v54, %v674_v19 }
 0x196   :  { %632 = vrot.lane.b32.xlu1 %v2505_v13, %s1884_s25  ;;  %725 = vrot.lane.b32.xlu0 %v381_v7, %s1884_s25  ;;  %v682_v8 = vpop.permute.xlu1 %681  ;;  %v1120_v13 = vld [vmem:[%s2894_s11] sm:$0xff] }
 0x197   :  { %v2590_v1 = vsel %vm642_vm4, %v678_v10, %v682_v8  ;;  %v2594_v15 = vsel %vm642_vm4, %v682_v8, %v670_v54  ;;  %v524_v10 = vld [vmem:[%s2888_s5] ss:$4 sm:$0xf] }
 0x19a   :  { %640 = vrot.lane.b32.xlu1 %v326_v59, %s1884_s25  ;;  %811 = vperm.xlu0 %1840, %v803_v31  }
 0x19e   :  { %717 = vrot.lane.b32.xlu1 %v379_v6, %s1884_s25  ;;  %1124 = vperm.xlu0 %1840, %v1120_v13   ;;  %v461_v6 = vmul.f32 %v2010_v21, %v2347_v44  ;;  %v462_v44 = vmul.f32 %v2010_v21, %v2342_v26  ;;  %v2637_v21 = vrot.slane %v524_v10, %v2107_v49 }
 0x1a2   :  { %721 = vrot.lane.b32.xlu1 %v380_v61, %s1884_s25  ;;  %1427 = vperm.xlu0 %1840, %v1424_v32  }
 0x1a6   :  { %729 = vrot.lane.b32.xlu1 %v382_v22, %s1884_s25 }
 0x1d0   :  { %v388_v4 = vpop.permute.xlu1 %387 }
 0x1d4   :  { %v384_v0 = vpop.permute.xlu0 %383  ;;  %v396_v59 = vpop.permute.xlu1 %395 }
 0x1d5   :  { %v404_v52 = vsel %vm399_vm3, %v384_v0, %v388_v4  ;;  %v406_v18 = vsel %vm399_vm3, %v396_v59, %v384_v0 }
 0x1d6   :  { %v421_v61 = vmul.f32 %v2096_v43, %v404_v52  ;;  %v420_v30 = vmul.f32 %v2096_v43, %v406_v18 }
 0x1d8   :  { %v469_v33 = vadd.f32 %v461_v6, %v421_v61  ;;  %v468_v7 = vadd.f32 %v460_v16, %v420_v30  ;;  %v392_v22 = vpop.permute.xlu0 %391  ;;  %v477_v2 = vpop.permute.xlu1 %476  ;;  %v2645_v6 = vrot.slane %v524_v10, %v2123_v56  ;;  %v2648_v16 = vrot.slane %v524_v10, %v2126_v57 }
 0x1d9   :  { %v400_v60 = vsel %vm399_vm3, %v392_v22, %v396_v59  ;;  %v402_v53 = vsel %vm399_vm3, %v388_v4, %v392_v22 }
 0x1da   :  { %v422_v54 = vmul.f32 %v2096_v43, %v402_v53  ;;  %v423_v45 = vmul.f32 %v2096_v43, %v400_v60  ;;  %v2641_v43 = vrot.slane %v524_v10, %v2110_v50 }
 0x1dc   :  { %v470_v19 = vadd.f32 %v462_v44, %v422_v54  ;;  %v471_v8 = vadd.f32 %v463_v34, %v423_v45  ;;  %v481_v31 = vpop.permute.xlu0 %480  ;;  %v485_v13 = vpop.permute.xlu1 %484 }
 0x1dd   :  { %v496_v32 = vsel %vm399_vm3, %v477_v2, %v481_v31  ;;  %v494_v26 = vsel %vm399_vm3, %v481_v31, %v485_v13  ;;  %v699_v31 = vmul.f32 %v2016_v24, %v2429_v9 }
 0x1de   :  { %v509_v29 = vmul.f32 %v2084_v37, %v496_v32  ;;  %v510_v4 = vmul.f32 %v2084_v37, %v494_v26 }
 0x1e0   :  { %v517_v0 = vadd.f32 %v509_v29, %v469_v33  ;;  %v518_v59 = vadd.f32 %v510_v4, %v470_v19  ;;  %v489_v52 = vpop.permute.xlu0 %488  ;;  %v631_v18 = vpop.permute.xlu1 %630 }
 0x1e1   :  { %v492_v61 = vsel %vm399_vm3, %v485_v13, %v489_v52  ;;  %v498_v30 = vsel %vm399_vm3, %v489_v52, %v477_v2  ;;  %v702_v2 = vmul.f32 %v2016_v24, %v2466_v3  ;;  %v700_v52 = vmul.f32 %v2016_v24, %v2424_v28 }
 0x1e2   :  { %v547_v22 = vmul.f32 %v2637_v21, %v517_v0  ;;  %v548_v60 = vmul.f32 %v2641_v43, %v518_v59  ;;  %v508_v33 = vmul.f32 %v2084_v37, %v498_v30  ;;  %v511_v53 = vmul.f32 %v2084_v37, %v492_v61 }
 0x1e3   :  { %v701_v61 = vmul.f32 %v2016_v24, %v2461_v23 }
 0x1e4   :  { %v620_v44 = vadd.f32 %v2353_v5, %v548_v60  ;;  %v516_v34 = vadd.f32 %v508_v33, %v468_v7  ;;  %v519_v54 = vadd.f32 %v511_v53, %v471_v8  ;;  %v627_v45 = vpop.permute.xlu0 %626  ;;  %v639_v10 = vpop.permute.xlu1 %638  ;;  %v619_v19 = vadd.f32 %v2301_v47, %v547_v22 }
 0x1e5   :  { %v647_v13 = vsel %vm642_vm4, %v627_v45, %v631_v18  ;;  %v649_v37 = vsel %vm642_vm4, %v639_v10, %v627_v45 }
 0x1e6   :  { %v546_v5 = vmul.f32 %v2645_v6, %v516_v34  ;;  %v549_v7 = vmul.f32 %v2648_v16, %v519_v54  ;;  %v659_v8 = vmul.f32 %v2088_v39, %v647_v13  ;;  %v662_v47 = vmul.f32 %v2088_v39, %v649_v37 }
 0x1e8   :  { %v618_v32 = vadd.f32 %v2299_v12, %v546_v5  ;;  %v707_v9 = vadd.f32 %v699_v31, %v659_v8  ;;  %v710_v26 = vadd.f32 %v702_v2, %v662_v47  ;;  %v635_v29 = vpop.permute.xlu0 %634  ;;  %v720_v3 = vpop.permute.xlu1 %719  ;;  %v621_v4 = vadd.f32 %v2355_v58, %v549_v7  ;;  %v1622_v58 = vld [vmem:[%s2888_s5 + $0x2] ss:$4 sm:$0xf] }
 0x1e9   :  { %v643_v0 = vsel %vm642_vm4, %v635_v29, %v639_v10  ;;  %v645_v59 = vsel %vm642_vm4, %v631_v18, %v635_v29  ;;  %v2692_v24 = vrot.slane %v1622_v58, %v2123_v56  ;;  %v2700_v31 = vrot.slane %v1622_v58, %v2107_v49 }
 0x1ea   :  { %v660_v12 = vmul.f32 %v2088_v39, %v645_v59  ;;  %v661_v30 = vmul.f32 %v2088_v39, %v643_v0  ;;  %v2696_v39 = vrot.slane %v1622_v58, %v2126_v57  ;;  %v2703_v2 = vrot.slane %v1622_v58, %v2110_v50 }
 0x1ec   :  { %v708_v22 = vadd.f32 %v700_v52, %v660_v12  ;;  %v709_v60 = vadd.f32 %v701_v61, %v661_v30  ;;  %v716_v33 = vpop.permute.xlu0 %715  ;;  %v728_v53 = vpop.permute.xlu1 %727 }
 0x1ed   :  { %v735_v18 = vsel %vm642_vm4, %v716_v33, %v720_v3  ;;  %v737_v28 = vsel %vm642_vm4, %v728_v53, %v716_v33 }
 0x1ee   :  { %v747_v23 = vmul.f32 %v2022_v36, %v735_v18  ;;  %v750_v34 = vmul.f32 %v2022_v36, %v737_v28 }
 0x1f0   :  { %v755_v54 = vadd.f32 %v747_v23, %v707_v9  ;;  %v758_v45 = vadd.f32 %v750_v34, %v710_v26  ;;  %v724_v10 = vpop.permute.xlu0 %723  ;;  %v467_v23 = vmul.f32 %v2082_v35, %v2569_v55 }
 0x1f1   :  { %v731_v56 = vsel %vm642_vm4, %v724_v10, %v728_v53  ;;  %v733_v13 = vsel %vm642_vm4, %v720_v3, %v724_v10 }
 0x1f2   :  { %v786_v57 = vmul.f32 %v2692_v24, %v755_v54  ;;  %v789_v37 = vmul.f32 %v2696_v39, %v758_v45  ;;  %v748_v5 = vmul.f32 %v2022_v36, %v733_v13  ;;  %v749_v7 = vmul.f32 %v2022_v36, %v731_v56 }
 0x1f3   :  { %v465_v36 = vmul.f32 %v2082_v35, %v2559_v17 }
 0x1f4   :  { %v794_v8 = vadd.f32 %v786_v57, %v618_v32  ;;  %v756_v49 = vadd.f32 %v748_v5, %v708_v22  ;;  %v757_v47 = vadd.f32 %v749_v7, %v709_v60  ;;  %v394_v9 = vpop.permute.xlu0 %393  ;;  %v386_v50 = vpop.permute.xlu1 %385  ;;  %v797_v26 = vadd.f32 %v789_v37, %v621_v4 }
 0x1f5   :  { %v466_v32 = vmul.f32 %v2082_v35, %v2555_v51 }
 0x1f6   :  { %v787_v29 = vmul.f32 %v2700_v31, %v756_v49  ;;  %v788_v0 = vmul.f32 %v2703_v2, %v757_v47  ;;  %v2716_v3 = vadd.f32 %v2100_v46, %v797_v26  ;;  %v2736_v17 = vadd.f32 %v2100_v46, %v794_v8 }
 0x1f8   :  { %v796_v59 = vadd.f32 %v788_v0, %v620_v44  ;;  %v479_v52 = vpop.permute.xlu0 %478  ;;  %1025 = vmatprep.mubr.f32.mxu1 %v2716_v3  ;;  %v390_v61 = vpop.permute.xlu1 %389  ;;  %v795_v12 = vadd.f32 %v787_v29, %v619_v19 }
 0x1f9   :  { %v403_v4 = vsel %vm399_vm3, %v390_v61, %v394_v9  ;;  %v405_v30 = vsel %vm399_vm3, %v386_v50, %v390_v61 }
 0x1fa   :  { %v2728_v58 = vadd.f32 %v2100_v46, %v796_v59  ;;  %v425_v44 = vmul.f32 %v2018_v25, %v405_v30  ;;  %v426_v22 = vmul.f32 %v2018_v25, %v403_v4  ;;  %v2733_v19 = vadd.f32 %v2100_v46, %v795_v12 }
 0x1fb   :  { %v464_v46 = vmul.f32 %v2082_v35, %v2573_v41 }
 0x1fc   :  { %v473_v51 = vadd.f32 %v465_v36, %v425_v44  ;;  %v474_v60 = vadd.f32 %v466_v32, %v426_v22  ;;  %v487_v33 = vpop.permute.xlu0 %486  ;;  %950 = vmatprep.mubr.f32.mxu0 %v2733_v19  ;;  %1026 = vmatmul.mubr.f32.vlgmr.msra.gmra.mrb[4].mxu1 %v2728_v58  ;;  %v398_v53 = vpop.permute.xlu1 %397  ;;  %v703_v36 = vmul.f32 %v2094_v42, %v2583_v14 }
 0x1fd   :  { %v401_v18 = vsel %vm399_vm3, %v394_v9, %v398_v53  ;;  %v407_v28 = vsel %vm399_vm3, %v398_v53, %v386_v50  ;;  %951 = vmatmul.mubr.f32.vlgmr.msra.gmra.mrb[4].mxu0 %v2736_v17 }
 0x1fe   :  { %v424_v34 = vmul.f32 %v2018_v25, %v407_v28  ;;  %v427_v54 = vmul.f32 %v2018_v25, %v401_v18 }
 0x200   :  { %v472_v45 = vadd.f32 %v464_v46, %v424_v34  ;;  %v475_v10 = vadd.f32 %v467_v23, %v427_v54  ;;  %v483_v56 = vpop.permute.xlu1 %482  ;;  %v629_v37 = vpop.permute.xlu0 %628  ;;  %v2905_v34 = vld [vmem:[#allocation5_spill] sm:$0xff] }
 0x201   :  { %v495_v13 = vsel %vm399_vm3, %v483_v56, %v487_v33  ;;  %v497_v57 = vsel %vm399_vm3, %v479_v52, %v483_v56 }
 0x202   :  { %v513_v5 = vmul.f32 %v2086_v38, %v497_v57  ;;  %v514_v41 = vmul.f32 %v2086_v38, %v495_v13 }
 0x204   :  { %v521_v7 = vadd.f32 %v513_v5, %v473_v51  ;;  %v522_v35 = vadd.f32 %v514_v41, %v474_v60  ;;  %v491_v55 = vpop.permute.xlu1 %490  ;;  %v637_v26 = vpop.permute.xlu0 %636 }
 0x205   :  { %v493_v25 = vsel %vm399_vm3, %v487_v33, %v491_v55  ;;  %v499_v8 = vsel %vm399_vm3, %v491_v55, %v479_v52 }
 0x206   :  { %v551_v49 = vmul.f32 %v2637_v21, %v521_v7  ;;  %v552_v47 = vmul.f32 %v2641_v43, %v522_v35  ;;  %v512_v9 = vmul.f32 %v2086_v38, %v499_v8  ;;  %v515_v50 = vmul.f32 %v2086_v38, %v493_v25 }
 0x207   :  { %v704_v21 = vmul.f32 %v2094_v42, %v2579_v62 }
 0x208   :  { %v520_v29 = vadd.f32 %v512_v9, %v472_v45  ;;  %v523_v0 = vadd.f32 %v515_v50, %v475_v10  ;;  %v633_v59 = vpop.permute.xlu1 %632  ;;  %v623_v61 = vadd.f32 %v2545_v20, %v551_v49  ;;  %v624_v12 = vadd.f32 %v2561_v63, %v552_v47  ;;  %v1037_v50 = vld [vmem:[%s2892_s9] sm:$0xf] }
 0x209   :  { %v646_v43 = vsel %vm642_vm4, %v633_v59, %v637_v26  ;;  %v648_v38 = vsel %vm642_vm4, %v629_v37, %v633_v59  ;;  %1040 = vperm.xlu1 %1841, %v1037_v50  }
 0x20a   :  { %v550_v52 = vmul.f32 %v2645_v6, %v520_v29  ;;  %v553_v32 = vmul.f32 %v2648_v16, %v523_v0  ;;  %v663_v20 = vmul.f32 %v2090_v40, %v648_v38  ;;  %v664_v63 = vmul.f32 %v2090_v40, %v646_v43 }
 0x20b   :  { %v705_v6 = vmul.f32 %v2094_v42, %v2590_v1  ;;  %v706_v16 = vmul.f32 %v2094_v42, %v2594_v15 }
 0x20c   :  { %v711_v4 = vadd.f32 %v703_v36, %v663_v20  ;;  %v712_v30 = vadd.f32 %v704_v21, %v664_v63  ;;  %v641_v14 = vpop.permute.xlu1 %640  ;;  %v622_v44 = vadd.f32 %v2543_v11, %v550_v52  ;;  %v625_v62 = vadd.f32 %v2563_v27, %v553_v32  ;;  %v726_v27 = vpop.permute.xlu0 %725 }
 0x20d   :  { %v644_v22 = vsel %vm642_vm4, %v637_v26, %v641_v14  ;;  %v650_v51 = vsel %vm642_vm4, %v641_v14, %v629_v37  ;;  %v1121_v26 = vld [vmem:[%s2894_s11 + $0x8] sm:$0xff]  ;;  %v1036_v14 = vld [vmem:[%s2891_s8] sm:$0xf] }
 0x20e   :  { %v665_v60 = vmul.f32 %v2090_v40, %v644_v22  ;;  %v666_v33 = vmul.f32 %v2090_v40, %v650_v51  ;;  %1129 = vperm.xlu1 %1841, %v1121_v26  }
 0x210   :  { %v713_v53 = vadd.f32 %v705_v6, %v665_v60  ;;  %v714_v11 = vadd.f32 %v706_v16, %v666_v33  ;;  %v718_v18 = vpop.permute.xlu1 %717  ;;  %v1119_v60 = vld [vmem:[%s2893_s10 + $0x8] sm:$0xff]  ;;  %v1887_v33 = vmov 1983009808  }
 0x214   :  { %v722_v28 = vpop.permute.xlu1 %721 }
 0x215   :  { %v734_v46 = vsel %vm642_vm4, %v722_v28, %v726_v27  ;;  %v736_v23 = vsel %vm642_vm4, %v718_v18, %v722_v28 }
 0x216   :  { %v751_v1 = vmul.f32 %v2905_v34, %v736_v23  ;;  %v752_v54 = vmul.f32 %v2905_v34, %v734_v46 }
 0x218   :  { %v759_v42 = vadd.f32 %v751_v1, %v711_v4  ;;  %v760_v15 = vadd.f32 %v752_v54, %v712_v30  ;;  %v730_v45 = vpop.permute.xlu1 %729 }
 0x219   :  { %v732_v40 = vsel %vm642_vm4, %v726_v27, %v730_v45  ;;  %v738_v10 = vsel %vm642_vm4, %v730_v45, %v718_v18  ;;  %v812_v55 = vpop.permute.xlu0 %811  ;;  %v1226_v18 = vld [vmem:[%s2895_s12] sm:$0xff]  ;;  %v2907_v27 = vld [vmem:[#allocation6_spill] sm:$0xff] }
 0x21a   :  { %v790_v56 = vmul.f32 %v2692_v24, %v759_v42  ;;  %v791_v13 = vmul.f32 %v2700_v31, %v760_v15  ;;  %v753_v57 = vmul.f32 %v2905_v34, %v732_v40  ;;  %v754_v37 = vmul.f32 %v2905_v34, %v738_v10 }
 0x21b   :  { %v1228_v46 = vcombine.high %v1226_v18, %v1226_v18 }
 0x21c   :  { %v761_v5 = vadd.f32 %v753_v57, %v713_v53  ;;  %v762_v41 = vadd.f32 %v754_v37, %v714_v11  ;;  %v799_v7 = vadd.f32 %v791_v13, %v623_v61  ;;  %v798_v35 = vadd.f32 %v790_v56, %v622_v44  ;;  %v1118_v44 = vld [vmem:[%s2893_s10] sm:$0xff] }
 0x21d   :  { %v1230_v53 = vunpack.c.l.s4 %v1887_v33  ;;  %v1125_v45 = vpop.permute.xlu0 %1124 }
 0x21e   :  { %v792_v25 = vmul.f32 %v2703_v2, %v761_v5  ;;  %v793_v8 = vmul.f32 %v2696_v39, %v762_v41  ;;  %v2807_v49 = vadd.f32 %v812_v55, %v799_v7  ;;  %v2809_v48 = vadd.f32 %v812_v55, %v798_v35 }
 0x21f   :  { %v1885_v2 = vmov 0.0|0.0   ;;  %v2906_v39 = vmov 0.0   ;;  %v1231_v11 = vunpack.c.0.s8 %v1230_v53 }
 0x220   :  { %955 = vmatprep.mubr.f32.mxu0 %v2807_v49  ;;  %v801_v24 = vadd.f32 %v793_v8, %v625_v62  ;;  %v800_v31 = vadd.f32 %v792_v25, %v624_v12  ;;  %1795 = vmatprep.subr.bf16.mxu0 %v1885_v2 }
 0x221   :  { %956 = vmatmul.mubr.f32.gmra.mrb[6].mxu0 %v2809_v48  ;;  %v1234_v28 = vsub.s32 %v1231_v11, %v2907_v27 }
 0x222   :  { %v2813_v47 = vadd.f32 %v812_v55, %v801_v24  ;;  %v2815_v9 = vadd.f32 %v812_v55, %v800_v31  ;;  %1723 = vmatprep.mubr.msk.f32.mxu0 %vm1886_vm5, %v2906_v39 }
 0x223   :  { %v1235_v23 = vrot.slane %v1226_v18, %v1234_v28  ;;  %v1242_v34 = vrot.slane %v1228_v46, %v1234_v28 }
 0x224   :  { %1030 = vmatprep.mubr.f32.mxu1 %v2813_v47 }
 0x225   :  { %1031 = vmatmul.mubr.f32.gmra.mrb[6].mxu1 %v2815_v9  ;;  %v1243_v1 = vcombine.high %v1235_v23, %v1235_v23  ;;  %v1244_v54 = vcombine.high %v1242_v34, %v1242_v34 }
 0x226   :  { %1728 = vmatprep.mubr.msk.f32.mxu1 %vm1132_vm7, %v1118_v44 }
 0x288   :  { %v1041_v62 = vpop.permute.xlu1 %1040 }
 0x28d   :  { %v1130_v42 = vpop.permute.xlu1 %1129 }
 0x2cf   :  { %v1707_v29 = vpop.f32.mrb[4].mxu1 }
 0x2d0   :  { %v1669_v0 = vpop.f32.mrb[4].mxu0  ;;  %v1708_v59 = vpop.f32.mrb[5].mxu1 }
 0x2d1   :  { %v1709_v61 = vadd.f32 %v1708_v59, %v1707_v29  ;;  %v1670_v12 = vpop.f32.mrb[5].mxu0 }
 0x2d2   :  { %v1671_v36 = vadd.f32 %v1670_v12, %v1669_v0 }
 0x2d4   :  { %v1028_v21 = vadd.f32 %v1709_v61, %v1671_v36 }
 0x2f4   :  { %v1672_v43 = vpop.f32.mrb[6].mxu0 }
 0x2f5   :  { %v1673_v38 = vpop.f32.mrb[7].mxu0 }
 0x2f6   :  { %v1674_v52 = vadd.f32 %v1673_v38, %v1672_v43 }
 0x2f8   :  { %v1710_v32 = vpop.f32.mrb[6].mxu1 }
 0x2f9   :  { %v1711_v20 = vpop.f32.mrb[7].mxu1 }
 0x2fa   :  { %v1712_v63 = vadd.f32 %v1711_v20, %v1710_v32 }
 0x2fc   :  { %v1033_v4 = vadd.f32 %v1712_v63, %v1674_v52 }
 0x2fe   :  { %v1796_v30 = vpack.c.bf16 %v1033_v4, %v1028_v21 }
 0x300   :  { %1797 = vmatpush3.bf16.msra.mxu0 %v1796_v30 }
 0x301   :  { %1627 = vmatprep.subr.msk.mxu0 %vm1252_vm9, %v1243_v1 }
 0x303   :  { %1724 = vmatmul.mubr.msk.f32.vlgmr.msra.gmra.mrb[8].mxu0 %vm1043_vm6, %v1036_v14 }
 0x304   :  { %1325 = vmatprep.mubr.f32.mxu0 %v2906_v39  ;;  %1628 = vmatpush1.msk.msra.mxu0 %vm1252_vm9, %v1235_v23 }
 0x3d6   :  { %v1113_v22 = vpop.f32.mrb[8].mxu0 }
 0x3d7   :  { %v1114_v51 = vadd.f32 %v1113_v22, %v1041_v62  ;;  %v1725_v6 = vpop.f32.mrb[9].mxu0 }
 0x3d9   :  { %v1117_v16 = vmax.f32 %v1114_v51, 0.0 }
 0x3db   :  { %1726 = vmatprep.subr.msk.mxu1 %vm1139_vm8, %v1117_v16 }
 0x3dc   :  { %1727 = vmatpush3.msk.msra.mxu1 %vm1139_vm8, %v1117_v16 }
 0x3dd   :  { %1729 = vmatmul.mubr.msk.f32.vlgmr.msra.gmra.mrb[8].mxu1 %vm1132_vm7, %v1119_v60  ;;  %1631 = vmatprep.subr.msk.mxu1 %vm1252_vm9, %v1244_v54 }
 0x3de   :  { %1402 = vmatprep.mubr.f32.mxu1 %v2906_v39  ;;  %1632 = vmatpush1.msk.msra.mxu1 %vm1252_vm9, %v1242_v34 }
 0x4b0   :  { %v1730_v15 = vpop.f32.mrb[8].mxu1 }
 0x4b1   :  { %v1215_v40 = vadd.f32 %v1730_v15, %v1130_v42  ;;  %v1209_v10 = vpop.f32.mrb[9].mxu1  ;;  %v1843_v42 = vld [vmem:[%s2883_s0] sm:$0xff] }
 0x4b2   :  { %v1210_v56 = vadd.f32 %v1209_v10, %v1125_v45  ;;  %v1844_v45 = vld [vmem:[%s2883_s0 + $0x10] sm:$0xff]  ;;  %v1845_v10 = vld [vmem:[%s2883_s0 + $0x8] sm:$0xff] }
 0x4b3   :  { %v1219_v13 = vadd.f32 3.0, %v1215_v40 }
 0x4b4   :  { %v1218_v57 = vadd.f32 3.0, %v1210_v56 }
 0x4b5   :  { %v1221_v37 = vmax.f32 %v1219_v13, 0.0  ;;  %v1846_v13 = vld [vmem:[%s2883_s0 + $0x18] sm:$0xff] }
 0x4b6   :  { %v1220_v5 = vmax.f32 %v1218_v57, 0.0 }
 0x4b7   :  { %v1223_v7 = vmin.f32 %v1221_v37, 6.0 }
 0x4b8   :  { %v1222_v41 = vmin.f32 %v1220_v5, 6.0 }
 0x4b9   :  { %v1225_v55 = vmul.f32 0.16666667, %v1223_v7 }
 0x4ba   :  { %v1224_v35 = vmul.f32 0.16666667, %v1222_v41 }
 0x4bc   :  { %1629 = vmatmul.mubr.msk.f32.vlgmr.msra.gmra.mrb[10].mxu0 %vm1245_vm10, %v1224_v35  ;;  %1633 = vmatmul.mubr.msk.f32.vlgmr.msra.gmra.mrb[10].mxu1 %vm1245_vm10, %v1224_v35 }
 0x4bd   :  { %1331 = vmatprep.mubr.f32.mxu0 %v2906_v39  ;;  %1408 = vmatprep.mubr.f32.mxu1 %v2906_v39 }
 0x4c0   :  { %1630 = vmatmul.mubr.msk.f32.gmra.mrb[12].mxu0 %vm1245_vm10, %v1225_v55  ;;  %1634 = vmatmul.mubr.msk.f32.gmra.mrb[12].mxu1 %vm1245_vm10, %v1225_v55 }
 0x4c1   :  { %1497 = vmatprep.mubr.f32.mxu0 %v2906_v39  ;;  %1568 = vmatprep.mubr.f32.mxu1 %v2906_v39 }
 0x58f   :  { %v1327_v25 = vpop.f32.mrb[10].mxu0  ;;  %v1404_v8 = vpop.f32.mrb[10].mxu1 }
 0x590   :  { %v1329_v24 = vpop.f32.mrb[11].mxu0  ;;  %v1406_v31 = vpop.f32.mrb[11].mxu1  ;;  %v1415_v26 = vmul.f32 %v1327_v25, %v2736_v17  ;;  %v1417_v29 = vmul.f32 %v1404_v8, %v2728_v58  ;;  %v1423_v58 = vld [vmem:[%s2896_s13] sm:$0xff]  ;;  %s1888_s13 = smov [#allocation2]  }
 0x591   :  { %v1416_v36 = vmul.f32 %v1329_v24, %v2733_v19  ;;  %v1418_v39 = vmul.f32 %v1406_v31, %v2716_v3  ;;  %v1428_v3 = vpop.permute.xlu0 %1427  ;;  %s1609_s19 = sshll.u32 %s1888_s13, 4  ;;  %s1610_s19 = int_to_ptr.vmem [resolvable:$true] %s1609_s19 }
 0x592   :  { %s1847_s23 = scalar_lea.vmem %s1610_s19, 512  ;;  %p1852_p1 = scmp.lt.s32.totalorder %s1610_s19, %s1610_s19 }
 0x593   :  { %v1333_v2 = vpop.f32.mrb[12].mxu0  ;;  %v1410_v50 = vpop.f32.mrb[12].mxu1  ;;  %p1848_p0 = scmp.ne.s32.totalorder %s1610_s19, %s1847_s23  ;;  %p1853_p2 = scmp.lt.s32.totalorder %s1847_s23, %s1847_s23 }
 0x594   :  { %v1419_v0 = vmul.f32 %v1333_v2, %v2809_v48  ;;  %v1421_v59 = vmul.f32 %v1410_v50, %v2815_v9  ;;  %v1335_v61 = vpop.f32.mrb[13].mxu0  ;;  %v1412_v12 = vpop.f32.mrb[13].mxu1 }
 0x595   :  { %v1420_v21 = vmul.f32 %v1335_v61, %v2807_v49  ;;  %v1422_v43 = vmul.f32 %v1412_v12, %v2813_v47  ;;  %p1854_p3 = por %p1853_p2, %p1852_p1 }
 0x596   :  { %v1800_v38 = vpack.c.bf16 %v1419_v0, %v1415_v26  ;;  %v1804_v52 = vpack.c.bf16 %v1421_v59, %v1417_v29 }
 0x597   :  { %v1798_v32 = vpack.c.bf16 %v1420_v21, %v1416_v36  ;;  %v1802_v17 = vpack.c.bf16 %v1422_v43, %v1418_v39  ;;  %p1855_p4 = pnand %p1854_p3, %p1848_p0 }
 0x599   :  { %1799 = vmatprep.subr.bf16.mxu0 %v1798_v32  ;;  %1803 = vmatprep.subr.bf16.mxu1 %v1802_v17 }
 0x59a   :  { %1801 = vmatpush1.bf16.msra.mxu0 %v1800_v38  ;;  %1805 = vmatpush1.bf16.msra.mxu1 %v1804_v52 }
 0x59d   :  { %1635 = vmatmul.mubr.msk.f32.vlgmr.msra.gmra.mrb[14].mxu0 %vm1043_vm6, %v1423_v58  ;;  %1636 = vmatmul.mubr.msk.f32.vlgmr.msra.gmra.mrb[14].mxu1 %vm1043_vm6, %v1423_v58 }
 0x670   :  { %v1499_v19 = vpop.f32.mrb[14].mxu0  ;;  %v1570_v49 = vpop.f32.mrb[14].mxu1 }
 0x671   :  { %v1500_v48 = vadd.f32 %v1499_v19, %v1428_v3  ;;  %v1571_v47 = vadd.f32 %v1570_v49, %v1428_v3  ;;  %v1501_v9 = vpop.f32.mrb[15].mxu0  ;;  %v1572_v20 = vpop.f32.mrb[15].mxu1 }
 0x672   :  { %v1502_v63 = vadd.f32 %v1501_v9, %v1428_v3  ;;  %v1573_v4 = vadd.f32 %v1572_v20, %v1428_v3 }
 0x673   :  { %v1575_v30 = vadd.f32 3.0, %v1500_v48  ;;  %v1577_v14 = vadd.f32 3.0, %v1571_v47 }
 0x674   :  { %v1576_v44 = vadd.f32 3.0, %v1502_v63  ;;  %v1578_v62 = vadd.f32 3.0, %v1573_v4 }
 0x675   :  { %v1579_v22 = vmax.f32 %v1575_v30, 0.0  ;;  %v1581_v51 = vmax.f32 %v1577_v14, 0.0 }
 0x676   :  { %v1580_v6 = vmax.f32 %v1576_v44, 0.0  ;;  %v1582_v16 = vmax.f32 %v1578_v62, 0.0 }
 0x677   :  { %v1583_v60 = vmin.f32 %v1579_v22, 6.0  ;;  %v1585_v33 = vmin.f32 %v1581_v51, 6.0 }
 0x678   :  { %v1584_v53 = vmin.f32 %v1580_v6, 6.0  ;;  %v1586_v11 = vmin.f32 %v1582_v16, 6.0 }
 0x679   :  { %v1587_v18 = vmul.f32 0.16666667, %v1583_v60  ;;  %v1589_v27 = vmul.f32 0.16666667, %v1585_v33 }
 0x67a   :  { %v1588_v28 = vmul.f32 0.16666667, %v1584_v53  ;;  %v1590_v46 = vmul.f32 0.16666667, %v1586_v11 }
 0x67b   :  { %v1591_v23 = vmul.f32 %v1587_v18, %v1500_v48  ;;  %v1593_v34 = vmul.f32 %v1589_v27, %v1571_v47 }
 0x67c   :  { %v1592_v1 = vmul.f32 %v1588_v28, %v1502_v63  ;;  %v1594_v54 = vmul.f32 %v1590_v46, %v1573_v4 }
 0x67d   :  { %v1595_v15 = vadd.f32 %v1843_v42, %v1591_v23  ;;  %v1597_v40 = vadd.f32 %v1844_v45, %v1593_v34 }
 0x67e   :  { %v1596_v56 = vadd.f32 %v1845_v10, %v1592_v1  ;;  %v1598_v57 = vadd.f32 %v1846_v13, %v1594_v54 }
 0x67f   :  { %1599 = vst [vmem:[#allocation2] sm:$0xff] %v1595_v15  ;;  %1601 = vst [vmem:[#allocation2 + $0x10] sm:$0xff] %v1597_v40 }
 0x680   :  { %1600 = vst [vmem:[#allocation2 + $0x8] sm:$0xff] %v1596_v56  ;;  %1602 = vst [vmem:[#allocation2 + $0x18] sm:$0xff] %v1598_v57 }
 0x681   :  { %1858 = shalt.err (!%p1855_p4)
}
 0x682   :  { %s1859_s25 = scalar_lea.hbm %s2898_s15, 512 }
 0x683   :  { %p1860_p5 = scmp.ne.s32.totalorder %s2898_s15, %s1859_s25  ;;  %p1863_p6 = scmp.lt.u32.totalorder %s1859_s25, %s2898_s15 }
 0x685   :  { %p1865_p7 = pnand %p1863_p6, %p1860_p5 }
 0x687   :  { %1868 = shalt.err (!%p1865_p7)
}
 0x688   :  { %1612 = dma.vmem_to_hbm [thread:$0]  %s1610_s19, 512, %s2898_s15, [#allocation3]  }
 0x689   :  { %1869 = dma.done.wait [#allocation3], 512  }
 0x68a   :  { %1870 = vsyncadd [#allocation3], 4294966784 }
 0x68b   :  { %1616 = vsyncpa [#allocation3], 1 }

</bundles_post_ra>
